<compile_context>
chip_gen: v7x
topology: tpu7x:2x2x1
jax: 0.10.0
libtpu: 0.0.40
codegen_flags: <defaults>
</compile_context>

<pallas_src>
import jax
import jax.numpy as jnp
from jax import lax
from jax.experimental import pallas as pl
from jax.experimental.pallas import tpu as pltpu

# ---------------------------------------------------------------------------
# Model config (consistent with deeplog(input_size, hidden, layers, keys))
# ---------------------------------------------------------------------------
INPUT_SIZE = 16
HIDDEN_SIZE = 32
NUM_LAYERS = 2
NUM_KEYS = 28
BATCH = 8
SEQ = 8


# ---------------------------------------------------------------------------
# Pallas kernel: wavefronted LSTM stack + final FC on the last timestep.
# ---------------------------------------------------------------------------
def _make_kernel(num_layers: int, hidden: int, seq: int, batch: int):
    H, S, B = hidden, seq, batch

    def kernel(x_ref, *args):
        # args layout (all VMEM-resident):
        #   per layer l: w_ih_ref (in_dim, 4H), w_hh_ref (H, 4H), b_ref (1, 4H)
        #   then: w_fc_ref (H, Kp), b_fc_ref (1, Kp)
        #   then: out_ref (B, Kp)
        layer_refs = args[: 3 * num_layers]
        w_fc_ref = args[3 * num_layers]
        b_fc_ref = args[3 * num_layers + 1]
        out_ref = args[3 * num_layers + 2]

        # Load all weights once (hoisted out of the unrolled loops).
        w_ih = [layer_refs[3 * l][...] for l in range(num_layers)]
        w_hh = [layer_refs[3 * l + 1][...] for l in range(num_layers)]
        bias = [layer_refs[3 * l + 2][...] for l in range(num_layers)]

        # Hoisted per-column activation fix-up constants.  Weights for the
        # i/f/o gates were pre-scaled by 0.5 in prepare_params, so
        #   sigmoid(z) = 0.5 * tanh(z/2) + 0.5
        # is recovered with one tanh + one FMA on the full (B, 4H) vreg.
        lane = lax.broadcasted_iota(jnp.int32, (B, 4 * H), 1)
        is_g = (lane >= 2 * H) & (lane < 3 * H)
        act_scale = jnp.where(is_g, jnp.float32(1.0), jnp.float32(0.5))
        act_off = jnp.where(is_g, jnp.float32(0.0), jnp.float32(0.5))

        # Layer-0 input projection for ALL timesteps: one batched MXU matmul.
        # pre0: (S*B, 4H); each timestep slice is exactly one (8,128) vreg.
        pre0 = jnp.dot(x_ref[...], w_ih[0],
                       preferred_element_type=jnp.float32) + bias[0]

        h = [jnp.zeros((B, H), jnp.float32) for _ in range(num_layers)]
        c = [jnp.zeros((B, H), jnp.float32) for _ in range(num_layers)]

        def cell_step(pre, h_prev, c_prev, w_hh_l):
            gates = pre + jnp.dot(h_prev, w_hh_l,
                                  preferred_element_type=jnp.float32)  # (B,4H)
            t_act = jnp.tanh(gates)                 # single EUP push per step
            act = t_act * act_scale + act_off       # sigmoid for i/f/o, tanh for g
            i_g = act[:, 0 * H:1 * H]
            f_g = act[:, 1 * H:2 * H]
            g_g = act[:, 2 * H:3 * H]
            o_g = act[:, 3 * H:4 * H]
            c_new = f_g * c_prev + i_g * g_g
            h_new = o_g * jnp.tanh(c_new)
            return h_new, c_new

        # Wavefront over time: within step t, layer l consumes the freshly
        # produced layer l-1 hidden; layer-0 step t+1 is independent of
        # layer-1 step t, so the scheduler overlaps them.  Fully unrolled
        # (S, num_layers static and small).
        for t in range(S):
            for l in range(num_layers):
                if l == 0:
                    pre = pre0[t * B:(t + 1) * B, :]
                else:
                    pre = jnp.dot(h[l - 1], w_ih[l],
                                  preferred_element_type=jnp.float32) + bias[l]
                h[l], c[l] = cell_step(pre, h[l], c[l], w_hh[l])

        # fc(out[:, -1, :]) — lane-dense padded output, unmasked store.
        out_ref[...] = (
            jnp.dot(h[num_layers - 1], w_fc_ref[...],
                    preferred_element_type=jnp.float32)
            + b_fc_ref[...]
        )

    return kernel


# ---------------------------------------------------------------------------
# One-time parameter preparation (hoisted out of the per-call hot path)
# ---------------------------------------------------------------------------
def prepare_params(params):
    H = HIDDEN_SIZE
    col = jnp.arange(4 * H)
    is_g = (col >= 2 * H) & (col < 3 * H)
    # i/f/o columns pre-scaled by 0.5 so the kernel needs only a tanh.
    gate_scale = jnp.where(is_g, 1.0, 0.5).astype(jnp.float32)        # (4H,)

    layers = []
    for (w_ih, w_hh, b_ih, b_hh) in params["lstm"]:
        w_ih_t = jnp.asarray(w_ih.T, jnp.float32) * gate_scale[None, :]   # (in, 4H)
        w_hh_t = jnp.asarray(w_hh.T, jnp.float32) * gate_scale[None, :]   # (H, 4H)
        b = ((b_ih + b_hh).astype(jnp.float32) * gate_scale).reshape(1, -1)
        layers.append((w_ih_t, w_hh_t, b))

    # Pad the FC output dim to a lane-dense multiple of 128 (sliced back in
    # the wrapper).  Padding is free at prep time.
    fc_w = jnp.asarray(params["fc_w"].T, jnp.float32)                  # (H, K)
    fc_b = jnp.asarray(params["fc_b"], jnp.float32).reshape(1, -1)     # (1, K)
    K = fc_w.shape[1]
    Kp = max(128, ((K + 127) // 128) * 128)
    fc_w_p = jnp.zeros((fc_w.shape[0], Kp), jnp.float32).at[:, :K].set(fc_w)
    fc_b_p = jnp.zeros((1, Kp), jnp.float32).at[:, :K].set(fc_b)

    return {"layers": layers, "fc_w": fc_w_p, "fc_b": fc_b_p}


# ---------------------------------------------------------------------------
# Jitted forward wrapper
# ---------------------------------------------------------------------------
@jax.jit
def deeplog_forward(input0, prepped):
    """input0: (B, S, input_size) batch_first, like PyTorch features[0]."""
    B, S, I = input0.shape
    # Time-major + flatten so each timestep is a contiguous (B, I) sublane block.
    x_flat = jnp.transpose(input0.astype(jnp.float32), (1, 0, 2)).reshape(S * B, I)

    call_args = [x_flat]
    for (w_ih, w_hh, b) in prepped["layers"]:
        call_args += [w_ih, w_hh, b]
    call_args += [prepped["fc_w"], prepped["fc_b"]]

    Kp = prepped["fc_w"].shape[1]
    vmem = pl.BlockSpec(memory_space=pltpu.MemorySpace.VMEM)

    # Total footprint (weights + activations) is ~100 KB — keep everything
    # VMEM-resident, no grid / tiling needed at these shapes (single TC is
    # optimal here; only at large batch on v7x would a parallel grid pay off).
    out_padded = pl.pallas_call(
        _make_kernel(len(prepped["layers"]), HIDDEN_SIZE, S, B),
        out_shape=jax.ShapeDtypeStruct((B, Kp), jnp.float32),
        in_specs=[vmem] * len(call_args),
        out_specs=vmem,
    )(*call_args)
    return out_padded[:, :NUM_KEYS]


# ---------------------------------------------------------------------------
# Pure-JAX reference (for correctness check)
# ---------------------------------------------------------------------------
def deeplog_reference(input0, params):
    x = input0.astype(jnp.float32)            # (B, S, I)
    B = x.shape[0]
    H = HIDDEN_SIZE
    seq = x
    for (w_ih, w_hh, b_ih, b_hh) in params["lstm"]:
        def cell(carry, xt, w_ih=w_ih, w_hh=w_hh, b_ih=b_ih, b_hh=b_hh):
            h, c = carry
            gates = xt @ w_ih.T + h @ w_hh.T + b_ih + b_hh
            i_g, f_g, g_g, o_g = jnp.split(gates, 4, axis=-1)
            i_g, f_g, o_g = jax.nn.sigmoid(i_g), jax.nn.sigmoid(f_g), jax.nn.sigmoid(o_g)
            g_g = jnp.tanh(g_g)
            c_new = f_g * c + i_g * g_g
            h_new = o_g * jnp.tanh(c_new)
            return (h_new, c_new), h_new
        h0 = jnp.zeros((B, H), jnp.float32)
        c0 = jnp.zeros((B, H), jnp.float32)
        (_, _), outs = lax.scan(cell, (h0, c0), jnp.transpose(seq, (1, 0, 2)))
        seq = jnp.transpose(outs, (1, 0, 2))  # (B, S, H)
    last = seq[:, -1, :]
    return last @ params["fc_w"].T + params["fc_b"]


# ---------------------------------------------------------------------------
# Deterministic parameter init (PyTorch-style uniform(-1/sqrt(H), 1/sqrt(H)))
# ---------------------------------------------------------------------------
def init_params(key):
    bound = 1.0 / (HIDDEN_SIZE ** 0.5)
    lstm = []
    for l in range(NUM_LAYERS):
        in_dim = INPUT_SIZE if l == 0 else HIDDEN_SIZE
        key, k1, k2, k3, k4 = jax.random.split(key, 5)
        w_ih = jax.random.uniform(k1, (4 * HIDDEN_SIZE, in_dim), jnp.float32, -bound, bound)
        w_hh = jax.random.uniform(k2, (4 * HIDDEN_SIZE, HIDDEN_SIZE), jnp.float32, -bound, bound)
        b_ih = jax.random.uniform(k3, (4 * HIDDEN_SIZE,), jnp.float32, -bound, bound)
        b_hh = jax.random.uniform(k4, (4 * HIDDEN_SIZE,), jnp.float32, -bound, bound)
        lstm.append((w_ih, w_hh, b_ih, b_hh))
    key, k5, k6 = jax.random.split(key, 3)
    fc_bound = 1.0 / (HIDDEN_SIZE ** 0.5)
    fc_w = jax.random.uniform(k5, (NUM_KEYS, HIDDEN_SIZE), jnp.float32, -fc_bound, fc_bound)
    fc_b = jax.random.uniform(k6, (NUM_KEYS,), jnp.float32, -fc_bound, fc_bound)
    return {"lstm": lstm, "fc_w": fc_w, "fc_b": fc_b}


if __name__ == "__main__":
    key = jax.random.PRNGKey(0)
    key, kx = jax.random.split(key)
    params = init_params(key)
    prepped = prepare_params(params)   # one-time weight prep, outside hot path

    # features is a tuple; forward uses features[0], shape (B, S, input_size)
    input0 = jax.random.normal(kx, (BATCH, SEQ, INPUT_SIZE), jnp.float32)
    features = (input0,)

    out = deeplog_forward(features[0], prepped)
    out = jax.block_until_ready(out)

    ref = deeplog_reference(features[0], params)
    assert out.shape == (BATCH, NUM_KEYS), out.shape
    assert jnp.allclose(out, ref, atol=1e-4, rtol=1e-4), "mismatch vs reference"

    print("KERNEL_OK")
</pallas_src>

<mosaic_0001>
module attributes {stable_mosaic.version = 11 : i64} {
  func.func @kernel(%arg0: memref<64x16xf32, #tpu.memory_space<vmem>>, %arg1: memref<16x128xf32, #tpu.memory_space<vmem>>, %arg2: memref<32x128xf32, #tpu.memory_space<vmem>>, %arg3: memref<1x128xf32, #tpu.memory_space<vmem>>, %arg4: memref<32x128xf32, #tpu.memory_space<vmem>>, %arg5: memref<32x128xf32, #tpu.memory_space<vmem>>, %arg6: memref<1x128xf32, #tpu.memory_space<vmem>>, %arg7: memref<32x128xf32, #tpu.memory_space<vmem>>, %arg8: memref<1x128xf32, #tpu.memory_space<vmem>>, %arg9: memref<8x128xf32, #tpu.memory_space<vmem>>) attributes {dimension_semantics = [], scalar_prefetch = 0 : i64, scratch_operands = 0 : i64, tpu.core_type = #tpu.core_type<tc>} {
    %c0 = arith.constant 0 : index
    %c0_0 = arith.constant 0 : index
    %0 = vector.load %arg1[%c0, %c0_0] : memref<16x128xf32, #tpu.memory_space<vmem>>, vector<16x128xf32>
    %c0_1 = arith.constant 0 : index
    %c0_2 = arith.constant 0 : index
    %1 = vector.load %arg4[%c0_1, %c0_2] : memref<32x128xf32, #tpu.memory_space<vmem>>, vector<32x128xf32>
    %c0_3 = arith.constant 0 : index
    %c0_4 = arith.constant 0 : index
    %2 = vector.load %arg2[%c0_3, %c0_4] : memref<32x128xf32, #tpu.memory_space<vmem>>, vector<32x128xf32>
    %c0_5 = arith.constant 0 : index
    %c0_6 = arith.constant 0 : index
    %3 = vector.load %arg5[%c0_5, %c0_6] : memref<32x128xf32, #tpu.memory_space<vmem>>, vector<32x128xf32>
    %c0_7 = arith.constant 0 : index
    %c0_8 = arith.constant 0 : index
    %4 = vector.load %arg3[%c0_7, %c0_8] : memref<1x128xf32, #tpu.memory_space<vmem>>, vector<1x128xf32>
    %c0_9 = arith.constant 0 : index
    %c0_10 = arith.constant 0 : index
    %5 = vector.load %arg6[%c0_9, %c0_10] : memref<1x128xf32, #tpu.memory_space<vmem>>, vector<1x128xf32>
    %6 = tpu.iota {dimensions = array<i32: 1>} : vector<8x128xi32>
    %c64_i32 = arith.constant 64 : i32
    %7 = vector.broadcast %c64_i32 : i32 to vector<8x128xi32>
    %8 = arith.cmpi sge, %6, %7 : vector<8x128xi32>
    %c96_i32 = arith.constant 96 : i32
    %9 = vector.broadcast %c96_i32 : i32 to vector<8x128xi32>
    %10 = arith.cmpi slt, %6, %9 : vector<8x128xi32>
    %11 = arith.andi %8, %10 : vector<8x128xi1>
    %cst = arith.constant 1.000000e+00 : f32
    %cst_11 = arith.constant 5.000000e-01 : f32
    %12 = vector.broadcast %cst : f32 to vector<8x128xf32>
    %13 = vector.broadcast %cst_11 : f32 to vector<8x128xf32>
    %14 = arith.select %11, %12, %13 : vector<8x128xi1>, vector<8x128xf32>
    %cst_12 = arith.constant 0.000000e+00 : f32
    %cst_13 = arith.constant 5.000000e-01 : f32
    %15 = vector.broadcast %cst_12 : f32 to vector<8x128xf32>
    %16 = vector.broadcast %cst_13 : f32 to vector<8x128xf32>
    %17 = arith.select %11, %15, %16 : vector<8x128xi1>, vector<8x128xf32>
    %c0_14 = arith.constant 0 : index
    %c0_15 = arith.constant 0 : index
    %18 = vector.load %arg0[%c0_14, %c0_15] : memref<64x16xf32, #tpu.memory_space<vmem>>, vector<64x16xf32>
    %cst_16 = arith.constant dense<0.000000e+00> : vector<64x128xf32>
    %19 = tpu.matmul %18, %0, %cst_16 {dimension_numbers = #tpu.dot_dimension_numbers<[1], [0], [0], [1], [0, 0, 1, 1], [], []>} : vector<64x16xf32>, vector<16x128xf32>, vector<64x128xf32> -> vector<64x128xf32>
    %20 = vector.broadcast %4 : vector<1x128xf32> to vector<64x128xf32>
    %21 = arith.addf %19, %20 : vector<64x128xf32>
    %cst_17 = arith.constant 0.000000e+00 : f32
    %22 = vector.broadcast %cst_17 : f32 to vector<8x32xf32>
    %cst_18 = arith.constant 0.000000e+00 : f32
    %23 = vector.broadcast %cst_18 : f32 to vector<8x32xf32>
    %cst_19 = arith.constant 0.000000e+00 : f32
    %24 = vector.broadcast %cst_19 : f32 to vector<8x32xf32>
    %cst_20 = arith.constant 0.000000e+00 : f32
    %25 = vector.broadcast %cst_20 : f32 to vector<8x32xf32>
    %26 = vector.extract_strided_slice %21 {offsets = [0, 0], sizes = [8, 128], strides = [1, 1]} : vector<64x128xf32> to vector<8x128xf32>
    %cst_21 = arith.constant dense<0.000000e+00> : vector<8x128xf32>
    %27 = tpu.matmul %22, %2, %cst_21 {dimension_numbers = #tpu.dot_dimension_numbers<[1], [0], [0], [1], [0, 0, 1, 1], [], []>} : vector<8x32xf32>, vector<32x128xf32>, vector<8x128xf32> -> vector<8x128xf32>
    %28 = arith.addf %26, %27 : vector<8x128xf32>
    %29 = math.tanh %28 : vector<8x128xf32>
    %30 = arith.mulf %29, %14 : vector<8x128xf32>
    %31 = arith.addf %30, %17 : vector<8x128xf32>
    %32 = vector.extract_strided_slice %31 {offsets = [0, 0], sizes = [8, 32], strides = [1, 1]} : vector<8x128xf32> to vector<8x32xf32>
    %33 = vector.extract_strided_slice %31 {offsets = [0, 32], sizes = [8, 32], strides = [1, 1]} : vector<8x128xf32> to vector<8x32xf32>
    %34 = vector.extract_strided_slice %31 {offsets = [0, 64], sizes = [8, 32], strides = [1, 1]} : vector<8x128xf32> to vector<8x32xf32>
    %35 = vector.extract_strided_slice %31 {offsets = [0, 96], sizes = [8, 32], strides = [1, 1]} : vector<8x128xf32> to vector<8x32xf32>
    %36 = arith.mulf %33, %24 : vector<8x32xf32>
    %37 = arith.mulf %32, %34 : vector<8x32xf32>
    %38 = arith.addf %36, %37 : vector<8x32xf32>
    %39 = math.tanh %38 : vector<8x32xf32>
    %40 = arith.mulf %35, %39 : vector<8x32xf32>
    %cst_22 = arith.constant dense<0.000000e+00> : vector<8x128xf32>
    %41 = tpu.matmul %40, %1, %cst_22 {dimension_numbers = #tpu.dot_dimension_numbers<[1], [0], [0], [1], [0, 0, 1, 1], [], []>} : vector<8x32xf32>, vector<32x128xf32>, vector<8x128xf32> -> vector<8x128xf32>
    %42 = vector.broadcast %5 : vector<1x128xf32> to vector<8x128xf32>
    %43 = arith.addf %41, %42 : vector<8x128xf32>
    %cst_23 = arith.constant dense<0.000000e+00> : vector<8x128xf32>
    %44 = tpu.matmul %23, %3, %cst_23 {dimension_numbers = #tpu.dot_dimension_numbers<[1], [0], [0], [1], [0, 0, 1, 1], [], []>} : vector<8x32xf32>, vector<32x128xf32>, vector<8x128xf32> -> vector<8x128xf32>
    %45 = arith.addf %43, %44 : vector<8x128xf32>
    %46 = math.tanh %45 : vector<8x128xf32>
    %47 = arith.mulf %46, %14 : vector<8x128xf32>
    %48 = arith.addf %47, %17 : vector<8x128xf32>
    %49 = vector.extract_strided_slice %48 {offsets = [0, 0], sizes = [8, 32], strides = [1, 1]} : vector<8x128xf32> to vector<8x32xf32>
    %50 = vector.extract_strided_slice %48 {offsets = [0, 32], sizes = [8, 32], strides = [1, 1]} : vector<8x128xf32> to vector<8x32xf32>
    %51 = vector.extract_strided_slice %48 {offsets = [0, 64], sizes = [8, 32], strides = [1, 1]} : vector<8x128xf32> to vector<8x32xf32>
    %52 = vector.extract_strided_slice %48 {offsets = [0, 96], sizes = [8, 32], strides = [1, 1]} : vector<8x128xf32> to vector<8x32xf32>
    %53 = arith.mulf %50, %25 : vector<8x32xf32>
    %54 = arith.mulf %49, %51 : vector<8x32xf32>
    %55 = arith.addf %53, %54 : vector<8x32xf32>
    %56 = math.tanh %55 : vector<8x32xf32>
    %57 = arith.mulf %52, %56 : vector<8x32xf32>
    %58 = vector.extract_strided_slice %21 {offsets = [8, 0], sizes = [8, 128], strides = [1, 1]} : vector<64x128xf32> to vector<8x128xf32>
    %cst_24 = arith.constant dense<0.000000e+00> : vector<8x128xf32>
    %59 = tpu.matmul %40, %2, %cst_24 {dimension_numbers = #tpu.dot_dimension_numbers<[1], [0], [0], [1], [0, 0, 1, 1], [], []>} : vector<8x32xf32>, vector<32x128xf32>, vector<8x128xf32> -> vector<8x128xf32>
    %60 = arith.addf %58, %59 : vector<8x128xf32>
    %61 = math.tanh %60 : vector<8x128xf32>
    %62 = arith.mulf %61, %14 : vector<8x128xf32>
    %63 = arith.addf %62, %17 : vector<8x128xf32>
    %64 = vector.extract_strided_slice %63 {offsets = [0, 0], sizes = [8, 32], strides = [1, 1]} : vector<8x128xf32> to vector<8x32xf32>
    %65 = vector.extract_strided_slice %63 {offsets = [0, 32], sizes = [8, 32], strides = [1, 1]} : vector<8x128xf32> to vector<8x32xf32>
    %66 = vector.extract_strided_slice %63 {offsets = [0, 64], sizes = [8, 32], strides = [1, 1]} : vector<8x128xf32> to vector<8x32xf32>
    %67 = vector.extract_strided_slice %63 {offsets = [0, 96], sizes = [8, 32], strides = [1, 1]} : vector<8x128xf32> to vector<8x32xf32>
    %68 = arith.mulf %65, %38 : vector<8x32xf32>
    %69 = arith.mulf %64, %66 : vector<8x32xf32>
    %70 = arith.addf %68, %69 : vector<8x32xf32>
    %71 = math.tanh %70 : vector<8x32xf32>
    %72 = arith.mulf %67, %71 : vector<8x32xf32>
    %cst_25 = arith.constant dense<0.000000e+00> : vector<8x128xf32>
    %73 = tpu.matmul %72, %1, %cst_25 {dimension_numbers = #tpu.dot_dimension_numbers<[1], [0], [0], [1], [0, 0, 1, 1], [], []>} : vector<8x32xf32>, vector<32x128xf32>, vector<8x128xf32> -> vector<8x128xf32>
    %74 = vector.broadcast %5 : vector<1x128xf32> to vector<8x128xf32>
    %75 = arith.addf %73, %74 : vector<8x128xf32>
    %cst_26 = arith.constant dense<0.000000e+00> : vector<8x128xf32>
    %76 = tpu.matmul %57, %3, %cst_26 {dimension_numbers = #tpu.dot_dimension_numbers<[1], [0], [0], [1], [0, 0, 1, 1], [], []>} : vector<8x32xf32>, vector<32x128xf32>, vector<8x128xf32> -> vector<8x128xf32>
    %77 = arith.addf %75, %76 : vector<8x128xf32>
    %78 = math.tanh %77 : vector<8x128xf32>
    %79 = arith.mulf %78, %14 : vector<8x128xf32>
    %80 = arith.addf %79, %17 : vector<8x128xf32>
    %81 = vector.extract_strided_slice %80 {offsets = [0, 0], sizes = [8, 32], strides = [1, 1]} : vector<8x128xf32> to vector<8x32xf32>
    %82 = vector.extract_strided_slice %80 {offsets = [0, 32], sizes = [8, 32], strides = [1, 1]} : vector<8x128xf32> to vector<8x32xf32>
    %83 = vector.extract_strided_slice %80 {offsets = [0, 64], sizes = [8, 32], strides = [1, 1]} : vector<8x128xf32> to vector<8x32xf32>
    %84 = vector.extract_strided_slice %80 {offsets = [0, 96], sizes = [8, 32], strides = [1, 1]} : vector<8x128xf32> to vector<8x32xf32>
    %85 = arith.mulf %82, %55 : vector<8x32xf32>
    %86 = arith.mulf %81, %83 : vector<8x32xf32>
    %87 = arith.addf %85, %86 : vector<8x32xf32>
    %88 = math.tanh %87 : vector<8x32xf32>
    %89 = arith.mulf %84, %88 : vector<8x32xf32>
    %90 = vector.extract_strided_slice %21 {offsets = [16, 0], sizes = [8, 128], strides = [1, 1]} : vector<64x128xf32> to vector<8x128xf32>
    %cst_27 = arith.constant dense<0.000000e+00> : vector<8x128xf32>
    %91 = tpu.matmul %72, %2, %cst_27 {dimension_numbers = #tpu.dot_dimension_numbers<[1], [0], [0], [1], [0, 0, 1, 1], [], []>} : vector<8x32xf32>, vector<32x128xf32>, vector<8x128xf32> -> vector<8x128xf32>
    %92 = arith.addf %90, %91 : vector<8x128xf32>
    %93 = math.tanh %92 : vector<8x128xf32>
    %94 = arith.mulf %93, %14 : vector<8x128xf32>
    %95 = arith.addf %94, %17 : vector<8x128xf32>
    %96 = vector.extract_strided_slice %95 {offsets = [0, 0], sizes = [8, 32], strides = [1, 1]} : vector<8x128xf32> to vector<8x32xf32>
    %97 = vector.extract_strided_slice %95 {offsets = [0, 32], sizes = [8, 32], strides = [1, 1]} : vector<8x128xf32> to vector<8x32xf32>
    %98 = vector.extract_strided_slice %95 {offsets = [0, 64], sizes = [8, 32], strides = [1, 1]} : vector<8x128xf32> to vector<8x32xf32>
    %99 = vector.extract_strided_slice %95 {offsets = [0, 96], sizes = [8, 32], strides = [1, 1]} : vector<8x128xf32> to vector<8x32xf32>
    %100 = arith.mulf %97, %70 : vector<8x32xf32>
    %101 = arith.mulf %96, %98 : vector<8x32xf32>
    %102 = arith.addf %100, %101 : vector<8x32xf32>
    %103 = math.tanh %102 : vector<8x32xf32>
    %104 = arith.mulf %99, %103 : vector<8x32xf32>
    %cst_28 = arith.constant dense<0.000000e+00> : vector<8x128xf32>
    %105 = tpu.matmul %104, %1, %cst_28 {dimension_numbers = #tpu.dot_dimension_numbers<[1], [0], [0], [1], [0, 0, 1, 1], [], []>} : vector<8x32xf32>, vector<32x128xf32>, vector<8x128xf32> -> vector<8x128xf32>
    %106 = vector.broadcast %5 : vector<1x128xf32> to vector<8x128xf32>
    %107 = arith.addf %105, %106 : vector<8x128xf32>
    %cst_29 = arith.constant dense<0.000000e+00> : vector<8x128xf32>
    %108 = tpu.matmul %89, %3, %cst_29 {dimension_numbers = #tpu.dot_dimension_numbers<[1], [0], [0], [1], [0, 0, 1, 1], [], []>} : vector<8x32xf32>, vector<32x128xf32>, vector<8x128xf32> -> vector<8x128xf32>
    %109 = arith.addf %107, %108 : vector<8x128xf32>
    %110 = math.tanh %109 : vector<8x128xf32>
    %111 = arith.mulf %110, %14 : vector<8x128xf32>
    %112 = arith.addf %111, %17 : vector<8x128xf32>
    %113 = vector.extract_strided_slice %112 {offsets = [0, 0], sizes = [8, 32], strides = [1, 1]} : vector<8x128xf32> to vector<8x32xf32>
    %114 = vector.extract_strided_slice %112 {offsets = [0, 32], sizes = [8, 32], strides = [1, 1]} : vector<8x128xf32> to vector<8x32xf32>
    %115 = vector.extract_strided_slice %112 {offsets = [0, 64], sizes = [8, 32], strides = [1, 1]} : vector<8x128xf32> to vector<8x32xf32>
    %116 = vector.extract_strided_slice %112 {offsets = [0, 96], sizes = [8, 32], strides = [1, 1]} : vector<8x128xf32> to vector<8x32xf32>
    %117 = arith.mulf %114, %87 : vector<8x32xf32>
    %118 = arith.mulf %113, %115 : vector<8x32xf32>
    %119 = arith.addf %117, %118 : vector<8x32xf32>
    %120 = math.tanh %119 : vector<8x32xf32>
    %121 = arith.mulf %116, %120 : vector<8x32xf32>
    %122 = vector.extract_strided_slice %21 {offsets = [24, 0], sizes = [8, 128], strides = [1, 1]} : vector<64x128xf32> to vector<8x128xf32>
    %cst_30 = arith.constant dense<0.000000e+00> : vector<8x128xf32>
    %123 = tpu.matmul %104, %2, %cst_30 {dimension_numbers = #tpu.dot_dimension_numbers<[1], [0], [0], [1], [0, 0, 1, 1], [], []>} : vector<8x32xf32>, vector<32x128xf32>, vector<8x128xf32> -> vector<8x128xf32>
    %124 = arith.addf %122, %123 : vector<8x128xf32>
    %125 = math.tanh %124 : vector<8x128xf32>
    %126 = arith.mulf %125, %14 : vector<8x128xf32>
    %127 = arith.addf %126, %17 : vector<8x128xf32>
    %128 = vector.extract_strided_slice %127 {offsets = [0, 0], sizes = [8, 32], strides = [1, 1]} : vector<8x128xf32> to vector<8x32xf32>
    %129 = vector.extract_strided_slice %127 {offsets = [0, 32], sizes = [8, 32], strides = [1, 1]} : vector<8x128xf32> to vector<8x32xf32>
    %130 = vector.extract_strided_slice %127 {offsets = [0, 64], sizes = [8, 32], strides = [1, 1]} : vector<8x128xf32> to vector<8x32xf32>
    %131 = vector.extract_strided_slice %127 {offsets = [0, 96], sizes = [8, 32], strides = [1, 1]} : vector<8x128xf32> to vector<8x32xf32>
    %132 = arith.mulf %129, %102 : vector<8x32xf32>
    %133 = arith.mulf %128, %130 : vector<8x32xf32>
    %134 = arith.addf %132, %133 : vector<8x32xf32>
    %135 = math.tanh %134 : vector<8x32xf32>
    %136 = arith.mulf %131, %135 : vector<8x32xf32>
    %cst_31 = arith.constant dense<0.000000e+00> : vector<8x128xf32>
    %137 = tpu.matmul %136, %1, %cst_31 {dimension_numbers = #tpu.dot_dimension_numbers<[1], [0], [0], [1], [0, 0, 1, 1], [], []>} : vector<8x32xf32>, vector<32x128xf32>, vector<8x128xf32> -> vector<8x128xf32>
    %138 = vector.broadcast %5 : vector<1x128xf32> to vector<8x128xf32>
    %139 = arith.addf %137, %138 : vector<8x128xf32>
    %cst_32 = arith.constant dense<0.000000e+00> : vector<8x128xf32>
    %140 = tpu.matmul %121, %3, %cst_32 {dimension_numbers = #tpu.dot_dimension_numbers<[1], [0], [0], [1], [0, 0, 1, 1], [], []>} : vector<8x32xf32>, vector<32x128xf32>, vector<8x128xf32> -> vector<8x128xf32>
    %141 = arith.addf %139, %140 : vector<8x128xf32>
    %142 = math.tanh %141 : vector<8x128xf32>
    %143 = arith.mulf %142, %14 : vector<8x128xf32>
    %144 = arith.addf %143, %17 : vector<8x128xf32>
    %145 = vector.extract_strided_slice %144 {offsets = [0, 0], sizes = [8, 32], strides = [1, 1]} : vector<8x128xf32> to vector<8x32xf32>
    %146 = vector.extract_strided_slice %144 {offsets = [0, 32], sizes = [8, 32], strides = [1, 1]} : vector<8x128xf32> to vector<8x32xf32>
    %147 = vector.extract_strided_slice %144 {offsets = [0, 64], sizes = [8, 32], strides = [1, 1]} : vector<8x128xf32> to vector<8x32xf32>
    %148 = vector.extract_strided_slice %144 {offsets = [0, 96], sizes = [8, 32], strides = [1, 1]} : vector<8x128xf32> to vector<8x32xf32>
    %149 = arith.mulf %146, %119 : vector<8x32xf32>
    %150 = arith.mulf %145, %147 : vector<8x32xf32>
    %151 = arith.addf %149, %150 : vector<8x32xf32>
    %152 = math.tanh %151 : vector<8x32xf32>
    %153 = arith.mulf %148, %152 : vector<8x32xf32>
    %154 = vector.extract_strided_slice %21 {offsets = [32, 0], sizes = [8, 128], strides = [1, 1]} : vector<64x128xf32> to vector<8x128xf32>
    %cst_33 = arith.constant dense<0.000000e+00> : vector<8x128xf32>
    %155 = tpu.matmul %136, %2, %cst_33 {dimension_numbers = #tpu.dot_dimension_numbers<[1], [0], [0], [1], [0, 0, 1, 1], [], []>} : vector<8x32xf32>, vector<32x128xf32>, vector<8x128xf32> -> vector<8x128xf32>
    %156 = arith.addf %154, %155 : vector<8x128xf32>
    %157 = math.tanh %156 : vector<8x128xf32>
    %158 = arith.mulf %157, %14 : vector<8x128xf32>
    %159 = arith.addf %158, %17 : vector<8x128xf32>
    %160 = vector.extract_strided_slice %159 {offsets = [0, 0], sizes = [8, 32], strides = [1, 1]} : vector<8x128xf32> to vector<8x32xf32>
    %161 = vector.extract_strided_slice %159 {offsets = [0, 32], sizes = [8, 32], strides = [1, 1]} : vector<8x128xf32> to vector<8x32xf32>
    %162 = vector.extract_strided_slice %159 {offsets = [0, 64], sizes = [8, 32], strides = [1, 1]} : vector<8x128xf32> to vector<8x32xf32>
    %163 = vector.extract_strided_slice %159 {offsets = [0, 96], sizes = [8, 32], strides = [1, 1]} : vector<8x128xf32> to vector<8x32xf32>
    %164 = arith.mulf %161, %134 : vector<8x32xf32>
    %165 = arith.mulf %160, %162 : vector<8x32xf32>
    %166 = arith.addf %164, %165 : vector<8x32xf32>
    %167 = math.tanh %166 : vector<8x32xf32>
    %168 = arith.mulf %163, %167 : vector<8x32xf32>
    %cst_34 = arith.constant dense<0.000000e+00> : vector<8x128xf32>
    %169 = tpu.matmul %168, %1, %cst_34 {dimension_numbers = #tpu.dot_dimension_numbers<[1], [0], [0], [1], [0, 0, 1, 1], [], []>} : vector<8x32xf32>, vector<32x128xf32>, vector<8x128xf32> -> vector<8x128xf32>
    %170 = vector.broadcast %5 : vector<1x128xf32> to vector<8x128xf32>
    %171 = arith.addf %169, %170 : vector<8x128xf32>
    %cst_35 = arith.constant dense<0.000000e+00> : vector<8x128xf32>
    %172 = tpu.matmul %153, %3, %cst_35 {dimension_numbers = #tpu.dot_dimension_numbers<[1], [0], [0], [1], [0, 0, 1, 1], [], []>} : vector<8x32xf32>, vector<32x128xf32>, vector<8x128xf32> -> vector<8x128xf32>
    %173 = arith.addf %171, %172 : vector<8x128xf32>
    %174 = math.tanh %173 : vector<8x128xf32>
    %175 = arith.mulf %174, %14 : vector<8x128xf32>
    %176 = arith.addf %175, %17 : vector<8x128xf32>
    %177 = vector.extract_strided_slice %176 {offsets = [0, 0], sizes = [8, 32], strides = [1, 1]} : vector<8x128xf32> to vector<8x32xf32>
    %178 = vector.extract_strided_slice %176 {offsets = [0, 32], sizes = [8, 32], strides = [1, 1]} : vector<8x128xf32> to vector<8x32xf32>
    %179 = vector.extract_strided_slice %176 {offsets = [0, 64], sizes = [8, 32], strides = [1, 1]} : vector<8x128xf32> to vector<8x32xf32>
    %180 = vector.extract_strided_slice %176 {offsets = [0, 96], sizes = [8, 32], strides = [1, 1]} : vector<8x128xf32> to vector<8x32xf32>
    %181 = arith.mulf %178, %151 : vector<8x32xf32>
    %182 = arith.mulf %177, %179 : vector<8x32xf32>
    %183 = arith.addf %181, %182 : vector<8x32xf32>
    %184 = math.tanh %183 : vector<8x32xf32>
    %185 = arith.mulf %180, %184 : vector<8x32xf32>
    %186 = vector.extract_strided_slice %21 {offsets = [40, 0], sizes = [8, 128], strides = [1, 1]} : vector<64x128xf32> to vector<8x128xf32>
    %cst_36 = arith.constant dense<0.000000e+00> : vector<8x128xf32>
    %187 = tpu.matmul %168, %2, %cst_36 {dimension_numbers = #tpu.dot_dimension_numbers<[1], [0], [0], [1], [0, 0, 1, 1], [], []>} : vector<8x32xf32>, vector<32x128xf32>, vector<8x128xf32> -> vector<8x128xf32>
    %188 = arith.addf %186, %187 : vector<8x128xf32>
    %189 = math.tanh %188 : vector<8x128xf32>
    %190 = arith.mulf %189, %14 : vector<8x128xf32>
    %191 = arith.addf %190, %17 : vector<8x128xf32>
    %192 = vector.extract_strided_slice %191 {offsets = [0, 0], sizes = [8, 32], strides = [1, 1]} : vector<8x128xf32> to vector<8x32xf32>
    %193 = vector.extract_strided_slice %191 {offsets = [0, 32], sizes = [8, 32], strides = [1, 1]} : vector<8x128xf32> to vector<8x32xf32>
    %194 = vector.extract_strided_slice %191 {offsets = [0, 64], sizes = [8, 32], strides = [1, 1]} : vector<8x128xf32> to vector<8x32xf32>
    %195 = vector.extract_strided_slice %191 {offsets = [0, 96], sizes = [8, 32], strides = [1, 1]} : vector<8x128xf32> to vector<8x32xf32>
    %196 = arith.mulf %193, %166 : vector<8x32xf32>
    %197 = arith.mulf %192, %194 : vector<8x32xf32>
    %198 = arith.addf %196, %197 : vector<8x32xf32>
    %199 = math.tanh %198 : vector<8x32xf32>
    %200 = arith.mulf %195, %199 : vector<8x32xf32>
    %cst_37 = arith.constant dense<0.000000e+00> : vector<8x128xf32>
    %201 = tpu.matmul %200, %1, %cst_37 {dimension_numbers = #tpu.dot_dimension_numbers<[1], [0], [0], [1], [0, 0, 1, 1], [], []>} : vector<8x32xf32>, vector<32x128xf32>, vector<8x128xf32> -> vector<8x128xf32>
    %202 = vector.broadcast %5 : vector<1x128xf32> to vector<8x128xf32>
    %203 = arith.addf %201, %202 : vector<8x128xf32>
    %cst_38 = arith.constant dense<0.000000e+00> : vector<8x128xf32>
    %204 = tpu.matmul %185, %3, %cst_38 {dimension_numbers = #tpu.dot_dimension_numbers<[1], [0], [0], [1], [0, 0, 1, 1], [], []>} : vector<8x32xf32>, vector<32x128xf32>, vector<8x128xf32> -> vector<8x128xf32>
    %205 = arith.addf %203, %204 : vector<8x128xf32>
    %206 = math.tanh %205 : vector<8x128xf32>
    %207 = arith.mulf %206, %14 : vector<8x128xf32>
    %208 = arith.addf %207, %17 : vector<8x128xf32>
    %209 = vector.extract_strided_slice %208 {offsets = [0, 0], sizes = [8, 32], strides = [1, 1]} : vector<8x128xf32> to vector<8x32xf32>
    %210 = vector.extract_strided_slice %208 {offsets = [0, 32], sizes = [8, 32], strides = [1, 1]} : vector<8x128xf32> to vector<8x32xf32>
    %211 = vector.extract_strided_slice %208 {offsets = [0, 64], sizes = [8, 32], strides = [1, 1]} : vector<8x128xf32> to vector<8x32xf32>
    %212 = vector.extract_strided_slice %208 {offsets = [0, 96], sizes = [8, 32], strides = [1, 1]} : vector<8x128xf32> to vector<8x32xf32>
    %213 = arith.mulf %210, %183 : vector<8x32xf32>
    %214 = arith.mulf %209, %211 : vector<8x32xf32>
    %215 = arith.addf %213, %214 : vector<8x32xf32>
    %216 = math.tanh %215 : vector<8x32xf32>
    %217 = arith.mulf %212, %216 : vector<8x32xf32>
    %218 = vector.extract_strided_slice %21 {offsets = [48, 0], sizes = [8, 128], strides = [1, 1]} : vector<64x128xf32> to vector<8x128xf32>
    %cst_39 = arith.constant dense<0.000000e+00> : vector<8x128xf32>
    %219 = tpu.matmul %200, %2, %cst_39 {dimension_numbers = #tpu.dot_dimension_numbers<[1], [0], [0], [1], [0, 0, 1, 1], [], []>} : vector<8x32xf32>, vector<32x128xf32>, vector<8x128xf32> -> vector<8x128xf32>
    %220 = arith.addf %218, %219 : vector<8x128xf32>
    %221 = math.tanh %220 : vector<8x128xf32>
    %222 = arith.mulf %221, %14 : vector<8x128xf32>
    %223 = arith.addf %222, %17 : vector<8x128xf32>
    %224 = vector.extract_strided_slice %223 {offsets = [0, 0], sizes = [8, 32], strides = [1, 1]} : vector<8x128xf32> to vector<8x32xf32>
    %225 = vector.extract_strided_slice %223 {offsets = [0, 32], sizes = [8, 32], strides = [1, 1]} : vector<8x128xf32> to vector<8x32xf32>
    %226 = vector.extract_strided_slice %223 {offsets = [0, 64], sizes = [8, 32], strides = [1, 1]} : vector<8x128xf32> to vector<8x32xf32>
    %227 = vector.extract_strided_slice %223 {offsets = [0, 96], sizes = [8, 32], strides = [1, 1]} : vector<8x128xf32> to vector<8x32xf32>
    %228 = arith.mulf %225, %198 : vector<8x32xf32>
    %229 = arith.mulf %224, %226 : vector<8x32xf32>
    %230 = arith.addf %228, %229 : vector<8x32xf32>
    %231 = math.tanh %230 : vector<8x32xf32>
    %232 = arith.mulf %227, %231 : vector<8x32xf32>
    %cst_40 = arith.constant dense<0.000000e+00> : vector<8x128xf32>
    %233 = tpu.matmul %232, %1, %cst_40 {dimension_numbers = #tpu.dot_dimension_numbers<[1], [0], [0], [1], [0, 0, 1, 1], [], []>} : vector<8x32xf32>, vector<32x128xf32>, vector<8x128xf32> -> vector<8x128xf32>
    %234 = vector.broadcast %5 : vector<1x128xf32> to vector<8x128xf32>
    %235 = arith.addf %233, %234 : vector<8x128xf32>
    %cst_41 = arith.constant dense<0.000000e+00> : vector<8x128xf32>
    %236 = tpu.matmul %217, %3, %cst_41 {dimension_numbers = #tpu.dot_dimension_numbers<[1], [0], [0], [1], [0, 0, 1, 1], [], []>} : vector<8x32xf32>, vector<32x128xf32>, vector<8x128xf32> -> vector<8x128xf32>
    %237 = arith.addf %235, %236 : vector<8x128xf32>
    %238 = math.tanh %237 : vector<8x128xf32>
    %239 = arith.mulf %238, %14 : vector<8x128xf32>
    %240 = arith.addf %239, %17 : vector<8x128xf32>
    %241 = vector.extract_strided_slice %240 {offsets = [0, 0], sizes = [8, 32], strides = [1, 1]} : vector<8x128xf32> to vector<8x32xf32>
    %242 = vector.extract_strided_slice %240 {offsets = [0, 32], sizes = [8, 32], strides = [1, 1]} : vector<8x128xf32> to vector<8x32xf32>
    %243 = vector.extract_strided_slice %240 {offsets = [0, 64], sizes = [8, 32], strides = [1, 1]} : vector<8x128xf32> to vector<8x32xf32>
    %244 = vector.extract_strided_slice %240 {offsets = [0, 96], sizes = [8, 32], strides = [1, 1]} : vector<8x128xf32> to vector<8x32xf32>
    %245 = arith.mulf %242, %215 : vector<8x32xf32>
    %246 = arith.mulf %241, %243 : vector<8x32xf32>
    %247 = arith.addf %245, %246 : vector<8x32xf32>
    %248 = math.tanh %247 : vector<8x32xf32>
    %249 = arith.mulf %244, %248 : vector<8x32xf32>
    %250 = vector.extract_strided_slice %21 {offsets = [56, 0], sizes = [8, 128], strides = [1, 1]} : vector<64x128xf32> to vector<8x128xf32>
    %cst_42 = arith.constant dense<0.000000e+00> : vector<8x128xf32>
    %251 = tpu.matmul %232, %2, %cst_42 {dimension_numbers = #tpu.dot_dimension_numbers<[1], [0], [0], [1], [0, 0, 1, 1], [], []>} : vector<8x32xf32>, vector<32x128xf32>, vector<8x128xf32> -> vector<8x128xf32>
    %252 = arith.addf %250, %251 : vector<8x128xf32>
    %253 = math.tanh %252 : vector<8x128xf32>
    %254 = arith.mulf %253, %14 : vector<8x128xf32>
    %255 = arith.addf %254, %17 : vector<8x128xf32>
    %256 = vector.extract_strided_slice %255 {offsets = [0, 0], sizes = [8, 32], strides = [1, 1]} : vector<8x128xf32> to vector<8x32xf32>
    %257 = vector.extract_strided_slice %255 {offsets = [0, 32], sizes = [8, 32], strides = [1, 1]} : vector<8x128xf32> to vector<8x32xf32>
    %258 = vector.extract_strided_slice %255 {offsets = [0, 64], sizes = [8, 32], strides = [1, 1]} : vector<8x128xf32> to vector<8x32xf32>
    %259 = vector.extract_strided_slice %255 {offsets = [0, 96], sizes = [8, 32], strides = [1, 1]} : vector<8x128xf32> to vector<8x32xf32>
    %260 = arith.mulf %257, %230 : vector<8x32xf32>
    %261 = arith.mulf %256, %258 : vector<8x32xf32>
    %262 = arith.addf %260, %261 : vector<8x32xf32>
    %263 = math.tanh %262 : vector<8x32xf32>
    %264 = arith.mulf %259, %263 : vector<8x32xf32>
    %cst_43 = arith.constant dense<0.000000e+00> : vector<8x128xf32>
    %265 = tpu.matmul %264, %1, %cst_43 {dimension_numbers = #tpu.dot_dimension_numbers<[1], [0], [0], [1], [0, 0, 1, 1], [], []>} : vector<8x32xf32>, vector<32x128xf32>, vector<8x128xf32> -> vector<8x128xf32>
    %266 = vector.broadcast %5 : vector<1x128xf32> to vector<8x128xf32>
    %267 = arith.addf %265, %266 : vector<8x128xf32>
    %cst_44 = arith.constant dense<0.000000e+00> : vector<8x128xf32>
    %268 = tpu.matmul %249, %3, %cst_44 {dimension_numbers = #tpu.dot_dimension_numbers<[1], [0], [0], [1], [0, 0, 1, 1], [], []>} : vector<8x32xf32>, vector<32x128xf32>, vector<8x128xf32> -> vector<8x128xf32>
    %269 = arith.addf %267, %268 : vector<8x128xf32>
    %270 = math.tanh %269 : vector<8x128xf32>
    %271 = arith.mulf %270, %14 : vector<8x128xf32>
    %272 = arith.addf %271, %17 : vector<8x128xf32>
    %273 = vector.extract_strided_slice %272 {offsets = [0, 0], sizes = [8, 32], strides = [1, 1]} : vector<8x128xf32> to vector<8x32xf32>
    %274 = vector.extract_strided_slice %272 {offsets = [0, 32], sizes = [8, 32], strides = [1, 1]} : vector<8x128xf32> to vector<8x32xf32>
    %275 = vector.extract_strided_slice %272 {offsets = [0, 64], sizes = [8, 32], strides = [1, 1]} : vector<8x128xf32> to vector<8x32xf32>
    %276 = vector.extract_strided_slice %272 {offsets = [0, 96], sizes = [8, 32], strides = [1, 1]} : vector<8x128xf32> to vector<8x32xf32>
    %277 = arith.mulf %274, %247 : vector<8x32xf32>
    %278 = arith.mulf %273, %275 : vector<8x32xf32>
    %279 = arith.addf %277, %278 : vector<8x32xf32>
    %280 = math.tanh %279 : vector<8x32xf32>
    %281 = arith.mulf %276, %280 : vector<8x32xf32>
    %c0_45 = arith.constant 0 : index
    %c0_46 = arith.constant 0 : index
    %282 = vector.load %arg7[%c0_45, %c0_46] : memref<32x128xf32, #tpu.memory_space<vmem>>, vector<32x128xf32>
    %cst_47 = arith.constant dense<0.000000e+00> : vector<8x128xf32>
    %283 = tpu.matmul %281, %282, %cst_47 {dimension_numbers = #tpu.dot_dimension_numbers<[1], [0], [0], [1], [0, 0, 1, 1], [], []>} : vector<8x32xf32>, vector<32x128xf32>, vector<8x128xf32> -> vector<8x128xf32>
    %c0_48 = arith.constant 0 : index
    %c0_49 = arith.constant 0 : index
    %284 = vector.load %arg8[%c0_48, %c0_49] : memref<1x128xf32, #tpu.memory_space<vmem>>, vector<1x128xf32>
    %285 = vector.broadcast %284 : vector<1x128xf32> to vector<8x128xf32>
    %286 = arith.addf %283, %285 : vector<8x128xf32>
    %c0_50 = arith.constant 0 : index
    %c0_51 = arith.constant 0 : index
    %287 = vector.load %arg9[%c0_50, %c0_51] : memref<8x128xf32, #tpu.memory_space<vmem>>, vector<8x128xf32>
    tpu.vector_store %arg9[%c0_50, %c0_51], %286 {strides = array<i32>} : memref<8x128xf32, #tpu.memory_space<vmem>>, vector<8x128xf32>,
    return
  }
}

</mosaic_0001>

<bundles_post_ra>
// kernel: deeplog_forward.1
= control target key start
LH: loop header
LB: loop body
LE: loop exit
PB: predicated region body
PF: predicated region fallthrough
CT: control target
= control target key end

     0   :  { %14 = vsyncpa [#allocation3], 0  ;;  %s3680_s0 = inlined_call_operand.vmem [shape: f32[64,16], index: 0, kind: input, shape index: {}]   ;;  %s3681_s1 = inlined_call_operand.hbm [shape: f32[16,128], index: 1, kind: input, shape index: {}]   ;;  %s3682_s2 = inlined_call_operand.vmem [shape: f32[32,128], index: 2, kind: input, shape index: {}]   ;;  %s3683_s3 = inlined_call_operand.vmem [shape: f32[1,128], index: 3, kind: input, shape index: {}]   ;;  %s3684_s4 = inlined_call_operand.vmem [shape: f32[32,128], index: 4, kind: input, shape index: {}]   ;;  %s3685_s5 = inlined_call_operand.vmem [shape: f32[32,128], index: 5, kind: input, shape index: {}]   ;;  %s3686_s6 = inlined_call_operand.vmem [shape: f32[1,128], index: 6, kind: input, shape index: {}]   ;;  %s3687_s7 = inlined_call_operand.vmem [shape: f32[32,128], index: 7, kind: input, shape index: {}]   ;;  %s3688_s8 = inlined_call_operand.vmem [shape: f32[1,128], index: 8, kind: input, shape index: {}]   ;;  %s3689_s9 = inlined_call_operand.hbm [shape: f32[8,128], index: 9, kind: output, shape index: {}]  }
   0x1   :  { %15 = vsyncpa [#allocation4], 0  ;;  %s3177_s30 = smov [#allocation2]   ;;  %s3129_s13 = scalar_lea.hbm %s3681_s1, 256 }
   0x2   :  { %s23_s10 = sshll.u32 %s3177_s30, 4  ;;  %p3130_p0 = scmp.ne.s32.totalorder %s3681_s1, %s3129_s13  ;;  %s24_s10 = int_to_ptr.vmem [resolvable:$true] %s23_s10 }
   0x3   :  { %p3133_p1 = scmp.lt.u32.totalorder %s3129_s13, %s3681_s1 }
   0x5   :  { %p3135_p2 = pnand %p3133_p1, %p3130_p0 }
   0x7   :  { %3138 = shalt.err (!%p3135_p2)
}
   0x8   :  { %s3139_s18 = scalar_lea.vmem %s24_s10, 256  ;;  %p3144_p4 = scmp.lt.s32.totalorder %s24_s10, %s24_s10 }
   0x9   :  { %p3140_p3 = scmp.ne.s32.totalorder %s24_s10, %s3139_s18  ;;  %p3145_p5 = scmp.lt.s32.totalorder %s3139_s18, %s3139_s18 }
   0xb   :  { %p3146_p6 = por %p3145_p5, %p3144_p4 }
   0xd   :  { %p3147_p7 = pnand %p3146_p6, %p3140_p3 }
   0xf   :  { %3150 = shalt.err (!%p3147_p7)
}
  0x10   :  { %s3178_s19 = smov 128   ;;  %s3179_s20 = smov 8  }
  0x11   :  { %29 = dma.hbm_to_vmem [thread:$0]  %s3681_s1, 256, %s24_s10, [#allocation3], %s3178_s19, %s3178_s19, %s3179_s20  }
  0x12   :  { %3173 = dma.done.wait [#allocation3], 256  }
  0x13   :  { %3174 = vsyncadd [#allocation3], 4294967040  ;;  %v3180_v0 = vmov 0.0|0.0   ;;  %vm3181_vm0 = vmmov 0   ;;  %v3182_v1 = vmov 0.0   ;;  %vm84_vm1 = vcmask 130048  }
  0x14   :  { %2881 = vmatprep.subr.bf16.mxu1 %v3180_v0  ;;  %2610 = vmatprep.mubr.msk.f32.mxu1 %vm3181_vm0, %v3182_v1  ;;  %v47_v2 = vld [vmem:[#allocation2] sm:$0xff]  ;;  %v48_v3 = vld [vmem:[#allocation2 + $0x8] sm:$0xff]  ;;  %v55_v9 = vld [vmem:[%s3682_s2 + $0x10] sm:$0xff]  ;;  %v63_v16 = vlaneseq  ;;  %v3183_v22 = vmov 0.5   ;;  %s3185_s14 = smov 32   ;;  %vm214_vm5 = vcmask 261120  }
  0x15   :  { %v53_v4 = vld [vmem:[%s3682_s2] sm:$0xff]  ;;  %v2877_v5 = vpack.c.bf16 %v48_v3, %v47_v2  ;;  %v54_v6 = vld [vmem:[%s3682_s2 + $0x8] sm:$0xff]  ;;  %v56_v10 = vld [vmem:[%s3682_s2 + $0x18] sm:$0xff] }
  0x16   :  { %v70_v7 = vld [vmem:[%s3680_s0] sm:$0xff]  ;;  %v3261_v8 = vpack.c.bf16 %v54_v6, %v53_v4  ;;  %v71_v11 = vld [vmem:[%s3680_s0 + $0x8] sm:$0xff]  ;;  %v3274_v12 = vpack.c.bf16 %v56_v10, %v55_v9  ;;  %v64_v21 = vand.u32 127, %v63_v16  ;;  %v72_v33 = vld [vmem:[%s3680_s0 + $0x10] sm:$0xff] }
  0x17   :  { %2590 = vmatprep.mubr.msk.f32.mxu0 %vm84_vm1, %v70_v7  ;;  %2878 = vmatprep.subr.bf16.mxu0 %v2877_v5  ;;  %v3291_v13 = vld [vmem:[%s3683_s3] ss:$0 sm:$0xff]  ;;  %s3184_s3 = smov 64   ;;  %v73_v34 = vld [vmem:[%s3680_s0 + $0x18] sm:$0xff]  ;;  %v50_v37 = vld [vmem:[%s3684_s4 + $0x8] sm:$0xff] }
  0x18   :  { %2883 = vmatpush3.bf16.msra.mxu1 %v3261_v8  ;;  %2880 = vmatpush3.bf16.msra.mxu0 %v2877_v5  ;;  %vm65_vm2 = vcmp.ge.s32.totalorder %v64_v21, 64  ;;  %vm66_vm3 = vcmp.lt.s32.totalorder %v64_v21, 96  ;;  %v74_v35 = vld [vmem:[%s3680_s0 + $0x20] sm:$0xff]  ;;  %v51_v39 = vld [vmem:[%s3684_s4 + $0x10] sm:$0xff]  ;;  %v75_v40 = vld [vmem:[%s3680_s0 + $0x28] sm:$0xff] }
  0x19   :  { %2884 = vmatprep.subr.bf16.mxu1 %v3180_v0  ;;  %2899 = vmatprep.subr.bf16.mxu0 %v3180_v0  ;;  %vm67_vm4 = vmand %vm65_vm2, %vm66_vm3  ;;  %v49_v36 = vld [vmem:[%s3684_s4] sm:$0xff]  ;;  %v52_v41 = vld [vmem:[%s3684_s4 + $0x18] sm:$0xff] }
  0x1a   :  { %v3296_v23 = vsel %vm67_vm4, 1.0, %v3183_v22  ;;  %v3298_v25 = vsel %vm67_vm4, 0.0, %v3183_v22  ;;  %v3324_v38 = vpack.c.bf16 %v50_v37, %v49_v36  ;;  %v76_v42 = vld [vmem:[%s3680_s0 + $0x30] sm:$0xff]  ;;  %v3340_v43 = vpack.c.bf16 %v52_v41, %v51_v39  ;;  %v77_v44 = vld [vmem:[%s3680_s0 + $0x38] sm:$0xff]  ;;  %v57_v54 = vld [vmem:[%s3685_s5] sm:$0xff] }
  0x1b   :  { %2591 = vmatmul.mubr.msk.f32.vlgmr.msra.gmra.mrb[0].mxu0 %vm84_vm1, %v71_v11  ;;  %v58_v55 = vld [vmem:[%s3685_s5 + $0x8] sm:$0xff]  ;;  %v59_v57 = vld [vmem:[%s3685_s5 + $0x10] sm:$0xff]  ;;  %v60_v58 = vld [vmem:[%s3685_s5 + $0x18] sm:$0xff] }
  0x1c   :  { %2886 = vmatpush3.bf16.msra.mxu1 %v3274_v12  ;;  %2901 = vmatpush3.bf16.msra.mxu0 %v3261_v8  ;;  %v3373_v56 = vpack.c.bf16 %v58_v55, %v57_v54  ;;  %v3384_v60 = vpack.c.bf16 %v60_v58, %v59_v57  ;;  %v3409_v3 = vld [vmem:[%s3686_s6] ss:$0 sm:$0xff] }
  0x1d   :  { %2887 = vmatprep.subr.bf16.mxu1 %v3180_v0  ;;  %2902 = vmatprep.subr.bf16.mxu0 %v3180_v0 }
  0x1e   :  { %2593 = vmatprep.mubr.msk.f32.mxu0 %vm84_vm1, %v72_v33 }
  0x1f   :  { %2611 = vmatmul.mubr.f32.vlgmr.msra.gmra.mrb[0].mxu1 %v3182_v1  ;;  %2594 = vmatmul.mubr.msk.f32.gmra.mrb[2].mxu0 %vm84_vm1, %v73_v34 }
  0x20   :  { %2904 = vmatpush3.bf16.msra.mxu0 %v3274_v12  ;;  %2621 = vmatprep.mubr.msk.f32.mxu1 %vm3181_vm0, %v3182_v1 }
  0x21   :  { %2905 = vmatprep.subr.bf16.mxu0 %v3180_v0  ;;  %2596 = vmatprep.mubr.msk.f32.mxu0 %vm84_vm1, %v74_v35 }
  0x22   :  { %2889 = vmatpush3.bf16.msra.mxu1 %v3324_v38 }
  0x23   :  { %2890 = vmatprep.subr.bf16.mxu1 %v3180_v0  ;;  %2597 = vmatmul.mubr.msk.f32.gmra.mrb[4].mxu0 %vm84_vm1, %v75_v40 }
  0x24   :  { %2599 = vmatprep.mubr.msk.f32.mxu0 %vm84_vm1, %v76_v42 }
  0x26   :  { %2892 = vmatpush3.bf16.msra.mxu1 %v3340_v43 }
  0x27   :  { %2893 = vmatprep.subr.bf16.mxu1 %v3180_v0  ;;  %2600 = vmatmul.mubr.msk.f32.gmra.mrb[6].mxu0 %vm84_vm1, %v77_v44 }
  0x28   :  { %2643 = vmatprep.mubr.msk.f32.mxu0 %vm3181_vm0, %v3182_v1 }
  0xee   :  { %v3293_v14 = vpop.f32.mrb[0].mxu0 }
  0xef   :  { %v175_v15 = vpop.f32.mrb[1].mxu0  ;;  %v181_v61 = vadd.f32 %v3293_v14, %v3291_v13 }
  0xf0   :  { %v176_v17 = vadd.f32 %v3291_v13, %v175_v15 }
  0xf2   :  { %v284_v18 = vpop.f32.mrb[0].mxu1  ;;  %v3355_v48 = vpop.f32.mrb[2].mxu0 }
  0xf3   :  { %v288_v19 = vadd.f32 %v284_v18, %v176_v17  ;;  %v2612_v20 = vpop.f32.mrb[1].mxu1  ;;  %v3357_v49 = vpop.f32.mrb[3].mxu0 }
  0xf4   :  { %v186_v36 = vadd.f32 %v3291_v13, %v3357_v49 }
  0xf5   :  { %3065 = vtanh.f32 %v288_v19 }
  0xf6   :  { %v3359_v50 = vpop.f32.mrb[4].mxu0 }
  0xf7   :  { %v3361_v51 = vpop.f32.mrb[5].mxu0 }
  0xfa   :  { %v3363_v52 = vpop.f32.mrb[6].mxu0 }
  0xfb   :  { %v3365_v53 = vpop.f32.mrb[7].mxu0 }
  0xff   :  { %v3066_v24 = vpop.eup %3065 }
 0x100   :  { %v290_v26 = vmul.f32 %v3066_v24, %v3296_v23 }
 0x102   :  { %v291_v27 = vadd.f32 %v290_v26, %v3298_v25 }
 0x104   :  { %294 = vrot.lane.b32.xlu0 %v291_v27, %s3184_s3  ;;  %v292_v30 = vmul.f32 0.0, %v291_v27 }
 0x176   :  { %v295_v28 = vpop.permute.xlu0 %294 }
 0x177   :  { %v297_v29 = vmul.f32 %v295_v28, %v291_v27 }
 0x179   :  { %299 = vrot.lane.b32.xlu0 %v297_v29, %s3185_s14 }
 0x1eb   :  { %v300_v31 = vpop.permute.xlu0 %299 }
 0x1ec   :  { %v3304_v32 = vadd.f32 %v300_v31, %v292_v30 }
 0x1ee   :  { %3067 = vtanh.f32 %v3304_v32 }
 0x1f8   :  { %v3068_v45 = vpop.eup %3067 }
 0x1f9   :  { %305 = vrot.lane.b32.xlu1 %v3068_v45, %s3184_s3 }
 0x26b   :  { %v306_v46 = vpop.permute.xlu1 %305 }
 0x26c   :  { %v308_v47 = vmul.f32 %v306_v46, %v291_v27 }
 0x26e   :  { %316 = vrot.lane.b32.xlu1 %v308_v47, %s3185_s14 }
 0x2e0   :  { %v317_v59 = vpop.permute.xlu1 %316 }
 0x2e1   :  { %2622 = vmatmul.mubr.msk.f32.vlgmr.msra.gmra.mrb[2].mxu1 %vm214_vm5, %v317_v59  ;;  %2644 = vmatmul.mubr.msk.f32.vlgmr.msra.gmra.mrb[8].mxu0 %vm214_vm5, %v317_v59 }
 0x2e2   :  { %2895 = vmatpush3.bf16.msra.mxu1 %v3373_v56  ;;  %2632 = vmatprep.mubr.msk.f32.mxu1 %vm3181_vm0, %v3182_v1 }
 0x2e3   :  { %2896 = vmatprep.subr.bf16.mxu1 %v3180_v0  ;;  %2907 = vmatpush3.bf16.msra.mxu0 %v3324_v38 }
 0x2e4   :  { %2908 = vmatprep.subr.bf16.mxu0 %v3180_v0  ;;  %2654 = vmatprep.mubr.msk.f32.mxu0 %vm3181_vm0, %v3182_v1 }
 0x2e6   :  { %2898 = vmatpush3.bf16.msra.mxu1 %v3384_v60 }
 0x2e7   :  { %2917 = vmatprep.subr.bf16.mxu1 %v3180_v0  ;;  %2910 = vmatpush3.bf16.msra.mxu0 %v3340_v43 }
 0x2e8   :  { %2911 = vmatprep.subr.bf16.mxu0 %v3180_v0 }
 0x2e9   :  { %2633 = vmatmul.mubr.f32.vlgmr.msra.gmra.mrb[2].mxu1 %v3182_v1 }
 0x2ea   :  { %2919 = vmatpush3.bf16.msra.mxu1 %v3261_v8  ;;  %2676 = vmatprep.mubr.msk.f32.mxu1 %vm3181_vm0, %v3182_v1 }
 0x2eb   :  { %2920 = vmatprep.subr.bf16.mxu1 %v3180_v0 }
 0x2ee   :  { %2922 = vmatpush3.bf16.msra.mxu1 %v3274_v12 }
 0x2ef   :  { %2923 = vmatprep.subr.bf16.mxu1 %v3180_v0 }
 0x3b4   :  { %v547_v62 = vpop.f32.mrb[8].mxu0 }
 0x3b5   :  { %v551_v63 = vadd.f32 %v547_v62, %v181_v61  ;;  %v2645_v2 = vpop.f32.mrb[9].mxu0 }
 0x3b7   :  { %3069 = vtanh.f32 %v551_v63 }
 0x3bc   :  { %v456_v4 = vpop.f32.mrb[2].mxu1 }
 0x3bd   :  { %v3031_v5 = vadd.f32 %v3409_v3, %v456_v4  ;;  %v2634_v6 = vpop.f32.mrb[3].mxu1 }
 0x3bf   :  { %3071 = vtanh.f32 %v3031_v5 }
 0x3c1   :  { %v3070_v7 = vpop.eup %3069 }
 0x3c2   :  { %v553_v9 = vmul.f32 %v3070_v7, %v3296_v23 }
 0x3c4   :  { %v554_v10 = vadd.f32 %v553_v9, %v3298_v25 }
 0x3c6   :  { %557 = vrot.lane.b32.xlu0 %v554_v10, %s3184_s3  ;;  %v555_v20 = vmul.f32 %v554_v10, %v3304_v32 }
 0x3c9   :  { %v3072_v11 = vpop.eup %3071 }
 0x3ca   :  { %v462_v14 = vmul.f32 %v3072_v11, %v3296_v23 }
 0x3cc   :  { %v463_v15 = vadd.f32 %v462_v14, %v3298_v25 }
 0x3ce   :  { %466 = vrot.lane.b32.xlu1 %v463_v15, %s3184_s3  ;;  %v464_v24 = vmul.f32 0.0, %v463_v15 }
 0x438   :  { %v558_v16 = vpop.permute.xlu0 %557 }
 0x439   :  { %v560_v17 = vmul.f32 %v558_v16, %v554_v10 }
 0x43b   :  { %562 = vrot.lane.b32.xlu0 %v560_v17, %s3185_s14 }
 0x440   :  { %v467_v18 = vpop.permute.xlu1 %466 }
 0x441   :  { %v469_v19 = vmul.f32 %v467_v18, %v463_v15  ;;  %v191_v18 = vadd.f32 %v3355_v48, %v3291_v13 }
 0x443   :  { %471 = vrot.lane.b32.xlu1 %v469_v19, %s3185_s14 }
 0x4ad   :  { %v563_v21 = vpop.permute.xlu0 %562 }
 0x4ae   :  { %v565_v22 = vadd.f32 %v563_v21, %v555_v20 }
 0x4b0   :  { %3073 = vtanh.f32 %v565_v22 }
 0x4b5   :  { %v472_v26 = vpop.permute.xlu1 %471 }
 0x4b6   :  { %v474_v27 = vadd.f32 %v472_v26, %v464_v24 }
 0x4b8   :  { %3075 = vtanh.f32 %v474_v27 }
 0x4ba   :  { %v3074_v28 = vpop.eup %3073 }
 0x4bb   :  { %568 = vrot.lane.b32.xlu0 %v3074_v28, %s3184_s3 }
 0x4c2   :  { %v3076_v29 = vpop.eup %3075 }
 0x4c3   :  { %477 = vrot.lane.b32.xlu1 %v3076_v29, %s3184_s3 }
 0x52d   :  { %v569_v30 = vpop.permute.xlu0 %568 }
 0x52e   :  { %v571_v31 = vmul.f32 %v569_v30, %v554_v10 }
 0x530   :  { %573 = vrot.lane.b32.xlu0 %v571_v31, %s3185_s14 }
 0x535   :  { %v478_v33 = vpop.permute.xlu1 %477 }
 0x536   :  { %v480_v34 = vmul.f32 %v478_v33, %v463_v15 }
 0x538   :  { %648 = vrot.lane.b32.xlu1 %v480_v34, %s3185_s14 }
 0x5a2   :  { %v574_v32 = vpop.permute.xlu0 %573 }
 0x5a3   :  { %2655 = vmatmul.mubr.msk.f32.vlgmr.msra.gmra.mrb[10].mxu0 %vm214_vm5, %v574_v32  ;;  %2677 = vmatmul.mubr.msk.f32.vlgmr.msra.gmra.mrb[4].mxu1 %vm214_vm5, %v574_v32 }
 0x5a4   :  { %2913 = vmatpush3.bf16.msra.mxu0 %v3373_v56  ;;  %2665 = vmatprep.mubr.msk.f32.mxu0 %vm3181_vm0, %v3182_v1 }
 0x5a5   :  { %2914 = vmatprep.subr.bf16.mxu0 %v3180_v0  ;;  %2925 = vmatpush3.bf16.msra.mxu1 %v3324_v38 }
 0x5a6   :  { %2926 = vmatprep.subr.bf16.mxu1 %v3180_v0  ;;  %2687 = vmatprep.mubr.msk.f32.mxu1 %vm3181_vm0, %v3182_v1 }
 0x5a8   :  { %2916 = vmatpush3.bf16.msra.mxu0 %v3384_v60 }
 0x5a9   :  { %2935 = vmatprep.subr.bf16.mxu0 %v3180_v0  ;;  %2928 = vmatpush3.bf16.msra.mxu1 %v3340_v43 }
 0x5aa   :  { %v649_v35 = vpop.permute.xlu1 %648  ;;  %2929 = vmatprep.subr.bf16.mxu1 %v3180_v0 }
 0x5ab   :  { %2666 = vmatmul.mubr.msk.f32.vlgmr.msra.gmra.mrb[10].mxu0 %vm214_vm5, %v649_v35 }
 0x5ac   :  { %2937 = vmatpush3.bf16.msra.mxu0 %v3261_v8  ;;  %2709 = vmatprep.mubr.msk.f32.mxu0 %vm3181_vm0, %v3182_v1 }
 0x5ad   :  { %2938 = vmatprep.subr.bf16.mxu0 %v3180_v0 }
 0x5b0   :  { %2940 = vmatpush3.bf16.msra.mxu0 %v3274_v12 }
 0x5b1   :  { %2941 = vmatprep.subr.bf16.mxu0 %v3180_v0 }
 0x676   :  { %v809_v37 = vpop.f32.mrb[4].mxu1 }
 0x677   :  { %v813_v39 = vadd.f32 %v809_v37, %v186_v36  ;;  %v2678_v40 = vpop.f32.mrb[5].mxu1 }
 0x679   :  { %3077 = vtanh.f32 %v813_v39 }
 0x67e   :  { %v718_v41 = vpop.f32.mrb[10].mxu0 }
 0x67f   :  { %v3032_v42 = vadd.f32 %v3409_v3, %v718_v41  ;;  %v2667_v44 = vpop.f32.mrb[11].mxu0 }
 0x681   :  { %3079 = vtanh.f32 %v3032_v42 }
 0x683   :  { %v3078_v45 = vpop.eup %3077 }
 0x684   :  { %v815_v46 = vmul.f32 %v3078_v45, %v3296_v23 }
 0x686   :  { %v816_v47 = vadd.f32 %v815_v46, %v3298_v25 }
 0x688   :  { %819 = vrot.lane.b32.xlu0 %v816_v47, %s3184_s3  ;;  %v817_v62 = vmul.f32 %v816_v47, %v565_v22 }
 0x68b   :  { %v3080_v54 = vpop.eup %3079 }
 0x68c   :  { %v724_v55 = vmul.f32 %v3080_v54, %v3296_v23 }
 0x68e   :  { %v725_v49 = vadd.f32 %v724_v55, %v3298_v25 }
 0x690   :  { %728 = vrot.lane.b32.xlu1 %v725_v49, %s3184_s3  ;;  %v726_v4 = vmul.f32 %v725_v49, %v474_v27 }
 0x6fa   :  { %v820_v57 = vpop.permute.xlu0 %819 }
 0x6fb   :  { %v822_v58 = vmul.f32 %v820_v57, %v816_v47 }
 0x6fd   :  { %824 = vrot.lane.b32.xlu0 %v822_v58, %s3185_s14  ;;  %v196_v58 = vadd.f32 %v3291_v13, %v3361_v51 }
 0x702   :  { %v729_v59 = vpop.permute.xlu1 %728 }
 0x703   :  { %v731_v61 = vmul.f32 %v729_v59, %v725_v49 }
 0x705   :  { %733 = vrot.lane.b32.xlu1 %v731_v61, %s3185_s14 }
 0x76f   :  { %v825_v63 = vpop.permute.xlu0 %824 }
 0x770   :  { %v827_v2 = vadd.f32 %v825_v63, %v817_v62 }
 0x772   :  { %3081 = vtanh.f32 %v827_v2 }
 0x777   :  { %v734_v5 = vpop.permute.xlu1 %733 }
 0x778   :  { %v736_v6 = vadd.f32 %v734_v5, %v726_v4 }
 0x77a   :  { %3083 = vtanh.f32 %v736_v6 }
 0x77c   :  { %v3082_v7 = vpop.eup %3081 }
 0x77d   :  { %830 = vrot.lane.b32.xlu0 %v3082_v7, %s3184_s3 }
 0x784   :  { %v3084_v9 = vpop.eup %3083 }
 0x785   :  { %739 = vrot.lane.b32.xlu1 %v3084_v9, %s3184_s3 }
 0x7ef   :  { %v831_v10 = vpop.permute.xlu0 %830 }
 0x7f0   :  { %v833_v11 = vmul.f32 %v831_v10, %v816_v47 }
 0x7f2   :  { %835 = vrot.lane.b32.xlu0 %v833_v11, %s3185_s14 }
 0x7f7   :  { %v740_v14 = vpop.permute.xlu1 %739 }
 0x7f8   :  { %v742_v15 = vmul.f32 %v740_v14, %v725_v49 }
 0x7fa   :  { %910 = vrot.lane.b32.xlu1 %v742_v15, %s3185_s14 }
 0x864   :  { %v836_v16 = vpop.permute.xlu0 %835 }
 0x865   :  { %2688 = vmatmul.mubr.msk.f32.vlgmr.msra.gmra.mrb[6].mxu1 %vm214_vm5, %v836_v16  ;;  %2710 = vmatmul.mubr.msk.f32.vlgmr.msra.gmra.mrb[12].mxu0 %vm214_vm5, %v836_v16 }
 0x866   :  { %2931 = vmatpush3.bf16.msra.mxu1 %v3373_v56  ;;  %2698 = vmatprep.mubr.msk.f32.mxu1 %vm3181_vm0, %v3182_v1 }
 0x867   :  { %2932 = vmatprep.subr.bf16.mxu1 %v3180_v0  ;;  %2943 = vmatpush3.bf16.msra.mxu0 %v3324_v38 }
 0x868   :  { %2944 = vmatprep.subr.bf16.mxu0 %v3180_v0  ;;  %2720 = vmatprep.mubr.msk.f32.mxu0 %vm3181_vm0, %v3182_v1 }
 0x86a   :  { %2934 = vmatpush3.bf16.msra.mxu1 %v3384_v60 }
 0x86b   :  { %2953 = vmatprep.subr.bf16.mxu1 %v3180_v0  ;;  %2946 = vmatpush3.bf16.msra.mxu0 %v3340_v43 }
 0x86c   :  { %v911_v17 = vpop.permute.xlu1 %910  ;;  %2947 = vmatprep.subr.bf16.mxu0 %v3180_v0 }
 0x86d   :  { %2699 = vmatmul.mubr.msk.f32.vlgmr.msra.gmra.mrb[6].mxu1 %vm214_vm5, %v911_v17 }
 0x86e   :  { %2955 = vmatpush3.bf16.msra.mxu1 %v3261_v8  ;;  %2742 = vmatprep.mubr.msk.f32.mxu1 %vm3181_vm0, %v3182_v1 }
 0x86f   :  { %2956 = vmatprep.subr.bf16.mxu1 %v3180_v0 }
 0x872   :  { %2958 = vmatpush3.bf16.msra.mxu1 %v3274_v12 }
 0x873   :  { %2959 = vmatprep.subr.bf16.mxu1 %v3180_v0 }
 0x938   :  { %v1071_v19 = vpop.f32.mrb[12].mxu0 }
 0x939   :  { %v1075_v20 = vadd.f32 %v1071_v19, %v191_v18  ;;  %v2711_v21 = vpop.f32.mrb[13].mxu0 }
 0x93b   :  { %3085 = vtanh.f32 %v1075_v20 }
 0x940   :  { %v980_v22 = vpop.f32.mrb[6].mxu1 }
 0x941   :  { %v3033_v24 = vadd.f32 %v3409_v3, %v980_v22  ;;  %v2700_v26 = vpop.f32.mrb[7].mxu1 }
 0x943   :  { %3087 = vtanh.f32 %v3033_v24 }
 0x945   :  { %v3086_v27 = vpop.eup %3085 }
 0x946   :  { %v1077_v28 = vmul.f32 %v3086_v27, %v3296_v23 }
 0x948   :  { %v1078_v29 = vadd.f32 %v1077_v28, %v3298_v25 }
 0x94a   :  { %1081 = vrot.lane.b32.xlu0 %v1078_v29, %s3184_s3  ;;  %v1079_v36 = vmul.f32 %v1078_v29, %v827_v2 }
 0x94d   :  { %v3088_v30 = vpop.eup %3087 }
 0x94e   :  { %v986_v31 = vmul.f32 %v3088_v30, %v3296_v23 }
 0x950   :  { %v987_v48 = vadd.f32 %v986_v31, %v3298_v25 }
 0x952   :  { %990 = vrot.lane.b32.xlu1 %v987_v48, %s3184_s3  ;;  %v988_v40 = vmul.f32 %v987_v48, %v736_v6 }
 0x9bc   :  { %v1082_v33 = vpop.permute.xlu0 %1081 }
 0x9bd   :  { %v1084_v34 = vmul.f32 %v1082_v33, %v1078_v29  ;;  %v201_v33 = vadd.f32 %v3359_v50, %v3291_v13 }
 0x9bf   :  { %1086 = vrot.lane.b32.xlu0 %v1084_v34, %s3185_s14 }
 0x9c4   :  { %v991_v32 = vpop.permute.xlu1 %990 }
 0x9c5   :  { %v993_v35 = vmul.f32 %v991_v32, %v987_v48 }
 0x9c7   :  { %995 = vrot.lane.b32.xlu1 %v993_v35, %s3185_s14 }
 0xa31   :  { %v1087_v37 = vpop.permute.xlu0 %1086 }
 0xa32   :  { %v1089_v39 = vadd.f32 %v1087_v37, %v1079_v36 }
 0xa34   :  { %3089 = vtanh.f32 %v1089_v39 }
 0xa39   :  { %v996_v41 = vpop.permute.xlu1 %995 }
 0xa3a   :  { %v998_v42 = vadd.f32 %v996_v41, %v988_v40 }
 0xa3c   :  { %3091 = vtanh.f32 %v998_v42 }
 0xa3e   :  { %v3090_v44 = vpop.eup %3089 }
 0xa3f   :  { %1092 = vrot.lane.b32.xlu0 %v3090_v44, %s3184_s3 }
 0xa46   :  { %v3092_v45 = vpop.eup %3091 }
 0xa47   :  { %1001 = vrot.lane.b32.xlu1 %v3092_v45, %s3184_s3 }
 0xab1   :  { %v1093_v46 = vpop.permute.xlu0 %1092 }
 0xab2   :  { %v1095_v47 = vmul.f32 %v1093_v46, %v1078_v29 }
 0xab4   :  { %1097 = vrot.lane.b32.xlu0 %v1095_v47, %s3185_s14 }
 0xab9   :  { %v1002_v54 = vpop.permute.xlu1 %1001 }
 0xaba   :  { %v1004_v55 = vmul.f32 %v1002_v54, %v987_v48 }
 0xabc   :  { %1172 = vrot.lane.b32.xlu1 %v1004_v55, %s3185_s14 }
 0xb26   :  { %v1098_v49 = vpop.permute.xlu0 %1097 }
 0xb27   :  { %2721 = vmatmul.mubr.msk.f32.vlgmr.msra.gmra.mrb[14].mxu0 %vm214_vm5, %v1098_v49  ;;  %2743 = vmatmul.mubr.msk.f32.vlgmr.msra.gmra.mrb[8].mxu1 %vm214_vm5, %v1098_v49 }
 0xb28   :  { %2949 = vmatpush3.bf16.msra.mxu0 %v3373_v56  ;;  %2731 = vmatprep.mubr.msk.f32.mxu0 %vm3181_vm0, %v3182_v1 }
 0xb29   :  { %2950 = vmatprep.subr.bf16.mxu0 %v3180_v0  ;;  %2961 = vmatpush3.bf16.msra.mxu1 %v3324_v38 }
 0xb2a   :  { %2962 = vmatprep.subr.bf16.mxu1 %v3180_v0  ;;  %2753 = vmatprep.mubr.msk.f32.mxu1 %vm3181_vm0, %v3182_v1 }
 0xb2c   :  { %2952 = vmatpush3.bf16.msra.mxu0 %v3384_v60 }
 0xb2d   :  { %2971 = vmatprep.subr.bf16.mxu0 %v3180_v0  ;;  %2964 = vmatpush3.bf16.msra.mxu1 %v3340_v43 }
 0xb2e   :  { %v1173_v57 = vpop.permute.xlu1 %1172  ;;  %2965 = vmatprep.subr.bf16.mxu1 %v3180_v0 }
 0xb2f   :  { %2732 = vmatmul.mubr.msk.f32.vlgmr.msra.gmra.mrb[14].mxu0 %vm214_vm5, %v1173_v57 }
 0xb30   :  { %2973 = vmatpush3.bf16.msra.mxu0 %v3261_v8  ;;  %2775 = vmatprep.mubr.msk.f32.mxu0 %vm3181_vm0, %v3182_v1 }
 0xb31   :  { %2974 = vmatprep.subr.bf16.mxu0 %v3180_v0 }
 0xb34   :  { %2976 = vmatpush3.bf16.msra.mxu0 %v3274_v12 }
 0xb35   :  { %2977 = vmatprep.subr.bf16.mxu0 %v3180_v0 }
 0xbfa   :  { %v1333_v59 = vpop.f32.mrb[8].mxu1 }
 0xbfb   :  { %v1337_v61 = vadd.f32 %v1333_v59, %v196_v58  ;;  %v2744_v62 = vpop.f32.mrb[9].mxu1 }
 0xbfd   :  { %3093 = vtanh.f32 %v1337_v61 }
 0xc02   :  { %v1242_v63 = vpop.f32.mrb[14].mxu0 }
 0xc03   :  { %v3034_v2 = vadd.f32 %v3409_v3, %v1242_v63  ;;  %v2733_v4 = vpop.f32.mrb[15].mxu0 }
 0xc05   :  { %3095 = vtanh.f32 %v3034_v2 }
 0xc07   :  { %v3094_v5 = vpop.eup %3093 }
 0xc08   :  { %v1339_v6 = vmul.f32 %v3094_v5, %v3296_v23 }
 0xc0a   :  { %v1340_v7 = vadd.f32 %v1339_v6, %v3298_v25 }
 0xc0c   :  { %1343 = vrot.lane.b32.xlu0 %v1340_v7, %s3184_s3  ;;  %v1341_v17 = vmul.f32 %v1340_v7, %v1089_v39 }
 0xc0f   :  { %v3096_v9 = vpop.eup %3095 }
 0xc10   :  { %v1248_v10 = vmul.f32 %v3096_v9, %v3296_v23 }
 0xc12   :  { %v1249_v51 = vadd.f32 %v1248_v10, %v3298_v25 }
 0xc14   :  { %1252 = vrot.lane.b32.xlu1 %v1249_v51, %s3184_s3  ;;  %v1250_v20 = vmul.f32 %v1249_v51, %v998_v42 }
 0xc7e   :  { %v1344_v11 = vpop.permute.xlu0 %1343 }
 0xc7f   :  { %v1346_v14 = vmul.f32 %v1344_v11, %v1340_v7 }
 0xc81   :  { %1348 = vrot.lane.b32.xlu0 %v1346_v14, %s3185_s14 }
 0xc86   :  { %v1253_v15 = vpop.permute.xlu1 %1252 }
 0xc87   :  { %v1255_v16 = vmul.f32 %v1253_v15, %v1249_v51 }
 0xc89   :  { %1257 = vrot.lane.b32.xlu1 %v1255_v16, %s3185_s14 }
 0xcf3   :  { %v1349_v18 = vpop.permute.xlu0 %1348 }
 0xcf4   :  { %v1351_v19 = vadd.f32 %v1349_v18, %v1341_v17 }
 0xcf6   :  { %3097 = vtanh.f32 %v1351_v19 }
 0xcfb   :  { %v1258_v21 = vpop.permute.xlu1 %1257 }
 0xcfc   :  { %v1260_v22 = vadd.f32 %v1258_v21, %v1250_v20 }
 0xcfe   :  { %3099 = vtanh.f32 %v1260_v22 }
 0xd00   :  { %v3098_v24 = vpop.eup %3097 }
 0xd01   :  { %1354 = vrot.lane.b32.xlu0 %v3098_v24, %s3184_s3 }
 0xd08   :  { %v3100_v26 = vpop.eup %3099 }
 0xd09   :  { %1263 = vrot.lane.b32.xlu1 %v3100_v26, %s3184_s3 }
 0xd73   :  { %v1355_v27 = vpop.permute.xlu0 %1354 }
 0xd74   :  { %v1357_v28 = vmul.f32 %v1355_v27, %v1340_v7 }
 0xd76   :  { %1359 = vrot.lane.b32.xlu0 %v1357_v28, %s3185_s14 }
 0xd7b   :  { %v1264_v29 = vpop.permute.xlu1 %1263 }
 0xd7c   :  { %v1266_v30 = vmul.f32 %v1264_v29, %v1249_v51  ;;  %v206_v51 = vadd.f32 %v3291_v13, %v3365_v53 }
 0xd7e   :  { %1434 = vrot.lane.b32.xlu1 %v1266_v30, %s3185_s14 }
 0xde8   :  { %v1360_v31 = vpop.permute.xlu0 %1359 }
 0xde9   :  { %2754 = vmatmul.mubr.msk.f32.vlgmr.msra.gmra.mrb[10].mxu1 %vm214_vm5, %v1360_v31  ;;  %2776 = vmatmul.mubr.msk.f32.vlgmr.msra.gmra.mrb[16].mxu0 %vm214_vm5, %v1360_v31 }
 0xdea   :  { %2967 = vmatpush3.bf16.msra.mxu1 %v3373_v56  ;;  %2764 = vmatprep.mubr.msk.f32.mxu1 %vm3181_vm0, %v3182_v1 }
 0xdeb   :  { %2968 = vmatprep.subr.bf16.mxu1 %v3180_v0  ;;  %2979 = vmatpush3.bf16.msra.mxu0 %v3324_v38 }
 0xdec   :  { %2980 = vmatprep.subr.bf16.mxu0 %v3180_v0  ;;  %2786 = vmatprep.mubr.msk.f32.mxu0 %vm3181_vm0, %v3182_v1 }
 0xdee   :  { %2970 = vmatpush3.bf16.msra.mxu1 %v3384_v60 }
 0xdef   :  { %2989 = vmatprep.subr.bf16.mxu1 %v3180_v0  ;;  %2982 = vmatpush3.bf16.msra.mxu0 %v3340_v43 }
 0xdf0   :  { %v1435_v48 = vpop.permute.xlu1 %1434  ;;  %2983 = vmatprep.subr.bf16.mxu0 %v3180_v0 }
 0xdf1   :  { %2765 = vmatmul.mubr.msk.f32.vlgmr.msra.gmra.mrb[10].mxu1 %vm214_vm5, %v1435_v48 }
 0xdf2   :  { %2991 = vmatpush3.bf16.msra.mxu1 %v3261_v8  ;;  %2808 = vmatprep.mubr.msk.f32.mxu1 %vm3181_vm0, %v3182_v1 }
 0xdf3   :  { %2992 = vmatprep.subr.bf16.mxu1 %v3180_v0 }
 0xdf6   :  { %2994 = vmatpush3.bf16.msra.mxu1 %v3274_v12 }
 0xdf7   :  { %2995 = vmatprep.subr.bf16.mxu1 %v3180_v0 }
 0xebc   :  { %v1595_v34 = vpop.f32.mrb[16].mxu0 }
 0xebd   :  { %v1599_v32 = vadd.f32 %v1595_v34, %v201_v33  ;;  %v2777_v35 = vpop.f32.mrb[17].mxu0 }
 0xebf   :  { %3101 = vtanh.f32 %v1599_v32 }
 0xec4   :  { %v1504_v36 = vpop.f32.mrb[10].mxu1 }
 0xec5   :  { %v3035_v37 = vadd.f32 %v3409_v3, %v1504_v36  ;;  %v2766_v39 = vpop.f32.mrb[11].mxu1 }
 0xec7   :  { %3103 = vtanh.f32 %v3035_v37 }
 0xec9   :  { %v3102_v40 = vpop.eup %3101 }
 0xeca   :  { %v1601_v41 = vmul.f32 %v3102_v40, %v3296_v23 }
 0xecc   :  { %v1602_v42 = vadd.f32 %v1601_v41, %v3298_v25 }
 0xece   :  { %1605 = vrot.lane.b32.xlu0 %v1602_v42, %s3184_s3  ;;  %v1603_v49 = vmul.f32 %v1602_v42, %v1351_v19 }
 0xed1   :  { %v3104_v44 = vpop.eup %3103 }
 0xed2   :  { %v1510_v45 = vmul.f32 %v3104_v44, %v3296_v23 }
 0xed4   :  { %v1511_v50 = vadd.f32 %v1510_v45, %v3298_v25 }
 0xed6   :  { %1514 = vrot.lane.b32.xlu1 %v1511_v50, %s3184_s3  ;;  %v1512_v59 = vmul.f32 %v1511_v50, %v1260_v22 }
 0xf40   :  { %v1606_v46 = vpop.permute.xlu0 %1605 }
 0xf41   :  { %v1608_v47 = vmul.f32 %v1606_v46, %v1602_v42 }
 0xf43   :  { %1610 = vrot.lane.b32.xlu0 %v1608_v47, %s3185_s14 }
 0xf48   :  { %v1515_v54 = vpop.permute.xlu1 %1514 }
 0xf49   :  { %v1517_v55 = vmul.f32 %v1515_v54, %v1511_v50 }
 0xf4b   :  { %1519 = vrot.lane.b32.xlu1 %v1517_v55, %s3185_s14 }
 0xfb5   :  { %v1611_v57 = vpop.permute.xlu0 %1610 }
 0xfb6   :  { %v1613_v58 = vadd.f32 %v1611_v57, %v1603_v49 }
 0xfb8   :  { %3105 = vtanh.f32 %v1613_v58 }
 0xfbd   :  { %v1520_v61 = vpop.permute.xlu1 %1519 }
 0xfbe   :  { %v1522_v62 = vadd.f32 %v1520_v61, %v1512_v59 }
 0xfc0   :  { %3107 = vtanh.f32 %v1522_v62 }
 0xfc2   :  { %v3106_v63 = vpop.eup %3105 }
 0xfc3   :  { %1616 = vrot.lane.b32.xlu0 %v3106_v63, %s3184_s3 }
 0xfca   :  { %v3108_v2 = vpop.eup %3107 }
 0xfcb   :  { %1525 = vrot.lane.b32.xlu1 %v3108_v2, %s3184_s3 }
0x1035   :  { %v1617_v4 = vpop.permute.xlu0 %1616 }
0x1036   :  { %v1619_v5 = vmul.f32 %v1617_v4, %v1602_v42 }
0x1038   :  { %1621 = vrot.lane.b32.xlu0 %v1619_v5, %s3185_s14 }
0x103d   :  { %v1526_v6 = vpop.permute.xlu1 %1525 }
0x103e   :  { %v1528_v7 = vmul.f32 %v1526_v6, %v1511_v50 }
0x1040   :  { %1696 = vrot.lane.b32.xlu1 %v1528_v7, %s3185_s14 }
0x10aa   :  { %v1622_v9 = vpop.permute.xlu0 %1621 }
0x10ab   :  { %2787 = vmatmul.mubr.msk.f32.vlgmr.msra.gmra.mrb[18].mxu0 %vm214_vm5, %v1622_v9  ;;  %2809 = vmatmul.mubr.msk.f32.vlgmr.msra.gmra.mrb[12].mxu1 %vm214_vm5, %v1622_v9 }
0x10ac   :  { %2985 = vmatpush3.bf16.msra.mxu0 %v3373_v56  ;;  %2797 = vmatprep.mubr.msk.f32.mxu0 %vm3181_vm0, %v3182_v1 }
0x10ad   :  { %2986 = vmatprep.subr.bf16.mxu0 %v3180_v0  ;;  %2997 = vmatpush3.bf16.msra.mxu1 %v3324_v38 }
0x10ae   :  { %2998 = vmatprep.subr.bf16.mxu1 %v3180_v0  ;;  %2819 = vmatprep.mubr.msk.f32.mxu1 %vm3181_vm0, %v3182_v1 }
0x10b0   :  { %2988 = vmatpush3.bf16.msra.mxu0 %v3384_v60 }
0x10b1   :  { %3007 = vmatprep.subr.bf16.mxu0 %v3180_v0  ;;  %3000 = vmatpush3.bf16.msra.mxu1 %v3340_v43 }
0x10b2   :  { %v1697_v10 = vpop.permute.xlu1 %1696  ;;  %3001 = vmatprep.subr.bf16.mxu1 %v3180_v0 }
0x10b3   :  { %2798 = vmatmul.mubr.msk.f32.vlgmr.msra.gmra.mrb[18].mxu0 %vm214_vm5, %v1697_v10 }
0x10b4   :  { %3009 = vmatpush3.bf16.msra.mxu0 %v3261_v8  ;;  %2841 = vmatprep.mubr.msk.f32.mxu0 %vm3181_vm0, %v3182_v1 }
0x10b5   :  { %3010 = vmatprep.subr.bf16.mxu0 %v3180_v0 }
0x10b8   :  { %3012 = vmatpush3.bf16.msra.mxu0 %v3274_v12 }
0x10b9   :  { %3013 = vmatprep.subr.bf16.mxu0 %v3180_v0 }
0x117e   :  { %v1857_v11 = vpop.f32.mrb[12].mxu1 }
0x117f   :  { %v1861_v14 = vadd.f32 %v1857_v11, %v206_v51  ;;  %v2810_v15 = vpop.f32.mrb[13].mxu1 }
0x1181   :  { %3109 = vtanh.f32 %v1861_v14 }
0x1186   :  { %v1766_v16 = vpop.f32.mrb[18].mxu0 }
0x1187   :  { %v3036_v17 = vadd.f32 %v3409_v3, %v1766_v16  ;;  %v2799_v8 = vpop.f32.mrb[19].mxu0 }
0x1189   :  { %3111 = vtanh.f32 %v3036_v17 }
0x118b   :  { %v3110_v18 = vpop.eup %3109 }
0x118c   :  { %v1863_v19 = vmul.f32 %v3110_v18, %v3296_v23 }
0x118e   :  { %v1864_v20 = vadd.f32 %v1863_v19, %v3298_v25 }
0x1190   :  { %1867 = vrot.lane.b32.xlu0 %v1864_v20, %s3184_s3  ;;  %v1865_v28 = vmul.f32 %v1864_v20, %v1613_v58 }
0x1193   :  { %v3112_v12 = vpop.eup %3111 }
0x1194   :  { %v1772_v21 = vmul.f32 %v3112_v12, %v3296_v23 }
0x1196   :  { %v1773_v53 = vadd.f32 %v1772_v21, %v3298_v25 }
0x1198   :  { %1776 = vrot.lane.b32.xlu1 %v1773_v53, %s3184_s3  ;;  %v1774_v31 = vmul.f32 %v1773_v53, %v1522_v62 }
0x1202   :  { %v1868_v22 = vpop.permute.xlu0 %1867 }
0x1203   :  { %v1870_v24 = vmul.f32 %v1868_v22, %v1864_v20 }
0x1205   :  { %1872 = vrot.lane.b32.xlu0 %v1870_v24, %s3185_s14  ;;  %v2318_v24 = vld [vmem:[%s3687_s7 + $0x18] sm:$0xff] }
0x120a   :  { %v1777_v26 = vpop.permute.xlu1 %1776 }
0x120b   :  { %v1779_v27 = vmul.f32 %v1777_v26, %v1773_v53 }
0x120d   :  { %1781 = vrot.lane.b32.xlu1 %v1779_v27, %s3185_s14 }
0x1277   :  { %v1873_v29 = vpop.permute.xlu0 %1872 }
0x1278   :  { %v1875_v30 = vadd.f32 %v1873_v29, %v1865_v28 }
0x127a   :  { %3113 = vtanh.f32 %v1875_v30 }
0x127f   :  { %v1782_v48 = vpop.permute.xlu1 %1781 }
0x1280   :  { %v1784_v33 = vadd.f32 %v1782_v48, %v1774_v31  ;;  %v2449_v31 = vld [vmem:[%s3688_s8] ss:$0 sm:$0xff] }
0x1282   :  { %3115 = vtanh.f32 %v1784_v33 }
0x1284   :  { %v3114_v34 = vpop.eup %3113 }
0x1285   :  { %1878 = vrot.lane.b32.xlu0 %v3114_v34, %s3184_s3 }
0x128c   :  { %v3116_v32 = vpop.eup %3115 }
0x128d   :  { %1787 = vrot.lane.b32.xlu1 %v3116_v32, %s3184_s3 }
0x12f7   :  { %v1879_v35 = vpop.permute.xlu0 %1878 }
0x12f8   :  { %v1881_v36 = vmul.f32 %v1879_v35, %v1864_v20 }
0x12fa   :  { %1883 = vrot.lane.b32.xlu0 %v1881_v36, %s3185_s14 }
0x12ff   :  { %v1788_v37 = vpop.permute.xlu1 %1787 }
0x1300   :  { %v1790_v39 = vmul.f32 %v1788_v37, %v1773_v53 }
0x1302   :  { %1958 = vrot.lane.b32.xlu1 %v1790_v39, %s3185_s14 }
0x136c   :  { %v1884_v40 = vpop.permute.xlu0 %1883 }
0x136d   :  { %2820 = vmatmul.mubr.msk.f32.vlgmr.msra.gmra.mrb[14].mxu1 %vm214_vm5, %v1884_v40  ;;  %2842 = vmatmul.mubr.msk.f32.vlgmr.msra.gmra.mrb[20].mxu0 %vm214_vm5, %v1884_v40 }
0x136e   :  { %3003 = vmatpush3.bf16.msra.mxu1 %v3373_v56  ;;  %2830 = vmatprep.mubr.msk.f32.mxu1 %vm3181_vm0, %v3182_v1 }
0x136f   :  { %3004 = vmatprep.subr.bf16.mxu1 %v3180_v0  ;;  %3015 = vmatpush3.bf16.msra.mxu0 %v3324_v38  ;;  %v211_v38 = vadd.f32 %v3363_v52, %v3291_v13 }
0x1370   :  { %3016 = vmatprep.subr.bf16.mxu0 %v3180_v0  ;;  %2852 = vmatprep.mubr.msk.f32.mxu0 %vm3181_vm0, %v3182_v1 }
0x1372   :  { %3006 = vmatpush3.bf16.msra.mxu1 %v3384_v60 }
0x1373   :  { %3018 = vmatpush3.bf16.msra.mxu0 %v3340_v43  ;;  %3025 = vmatprep.subr.bf16.mxu1 %v3180_v0 }
0x1374   :  { %v1959_v41 = vpop.permute.xlu1 %1958  ;;  %3019 = vmatprep.subr.bf16.mxu0 %v3180_v0 }
0x1375   :  { %2831 = vmatmul.mubr.msk.f32.vlgmr.msra.gmra.mrb[14].mxu1 %vm214_vm5, %v1959_v41 }
0x1376   :  { %2874 = vmatprep.mubr.msk.f32.mxu1 %vm3181_vm0, %v3182_v1 }
0x1440   :  { %v2119_v42 = vpop.f32.mrb[20].mxu0 }
0x1441   :  { %v2123_v44 = vadd.f32 %v2119_v42, %v211_v38  ;;  %v2843_v45 = vpop.f32.mrb[21].mxu0 }
0x1443   :  { %3117 = vtanh.f32 %v2123_v44 }
0x1448   :  { %v2028_v50 = vpop.f32.mrb[14].mxu1 }
0x1449   :  { %v3037_v43 = vadd.f32 %v3409_v3, %v2028_v50  ;;  %v2832_v46 = vpop.f32.mrb[15].mxu1 }
0x144b   :  { %3119 = vtanh.f32 %v3037_v43 }
0x144d   :  { %v3118_v47 = vpop.eup %3117 }
0x144e   :  { %v2125_v54 = vmul.f32 %v3118_v47, %v3296_v23 }
0x1450   :  { %v2126_v55 = vadd.f32 %v2125_v54, %v3298_v25 }
0x1452   :  { %2129 = vrot.lane.b32.xlu0 %v2126_v55, %s3184_s3  ;;  %v2127_v62 = vmul.f32 %v2126_v55, %v1875_v30 }
0x1455   :  { %v3120_v49 = vpop.eup %3119 }
0x1456   :  { %v2034_v57 = vmul.f32 %v3120_v49, %v3296_v23 }
0x1458   :  { %v2035_v13 = vadd.f32 %v2034_v57, %v3298_v25 }
0x145a   :  { %2038 = vrot.lane.b32.xlu1 %v2035_v13, %s3184_s3  ;;  %v2036_v4 = vmul.f32 %v2035_v13, %v1784_v33 }
0x14c4   :  { %v2130_v52 = vpop.permute.xlu0 %2129 }
0x14c5   :  { %v2132_v58 = vmul.f32 %v2130_v52, %v2126_v55 }
0x14c7   :  { %2134 = vrot.lane.b32.xlu0 %v2132_v58, %s3185_s14 }
0x14cc   :  { %v2039_v59 = vpop.permute.xlu1 %2038 }
0x14cd   :  { %v2041_v61 = vmul.f32 %v2039_v59, %v2035_v13 }
0x14cf   :  { %2043 = vrot.lane.b32.xlu1 %v2041_v61, %s3185_s14 }
0x1539   :  { %v2135_v63 = vpop.permute.xlu0 %2134 }
0x153a   :  { %v2137_v2 = vadd.f32 %v2135_v63, %v2127_v62 }
0x153c   :  { %3121 = vtanh.f32 %v2137_v2 }
0x1541   :  { %v2044_v5 = vpop.permute.xlu1 %2043 }
0x1542   :  { %v2046_v6 = vadd.f32 %v2044_v5, %v2036_v4 }
0x1544   :  { %3123 = vtanh.f32 %v2046_v6 }
0x1546   :  { %v3122_v7 = vpop.eup %3121 }
0x1547   :  { %2140 = vrot.lane.b32.xlu0 %v3122_v7, %s3184_s3 }
0x154e   :  { %v3124_v9 = vpop.eup %3123 }
0x154f   :  { %2049 = vrot.lane.b32.xlu1 %v3124_v9, %s3184_s3 }
0x15b9   :  { %v2141_v10 = vpop.permute.xlu0 %2140 }
0x15ba   :  { %v2143_v51 = vmul.f32 %v2141_v10, %v2126_v55 }
0x15bc   :  { %2145 = vrot.lane.b32.xlu0 %v2143_v51, %s3185_s14 }
0x15c1   :  { %v2050_v11 = vpop.permute.xlu1 %2049 }
0x15c2   :  { %v2052_v14 = vmul.f32 %v2050_v11, %v2035_v13 }
0x15c4   :  { %2220 = vrot.lane.b32.xlu1 %v2052_v14, %s3185_s14 }
0x162e   :  { %v2146_v15 = vpop.permute.xlu0 %2145 }
0x162f   :  { %2853 = vmatmul.mubr.msk.f32.vlgmr.msra.gmra.mrb[22].mxu0 %vm214_vm5, %v2146_v15 }
0x1630   :  { %3021 = vmatpush3.bf16.msra.mxu0 %v3373_v56  ;;  %2863 = vmatprep.mubr.msk.f32.mxu0 %vm3181_vm0, %v3182_v1 }
0x1631   :  { %3022 = vmatprep.subr.bf16.mxu0 %v3180_v0 }
0x1634   :  { %3024 = vmatpush3.bf16.msra.mxu0 %v3384_v60 }
0x1636   :  { %v2221_v16 = vpop.permute.xlu1 %2220 }
0x1637   :  { %2864 = vmatmul.mubr.msk.f32.vlgmr.msra.gmra.mrb[22].mxu0 %vm214_vm5, %v2221_v16 }
0x170a   :  { %v2290_v17 = vpop.f32.mrb[22].mxu0 }
0x170b   :  { %v3038_v8 = vadd.f32 %v3409_v3, %v2290_v17  ;;  %v2865_v18 = vpop.f32.mrb[23].mxu0  ;;  %v2315_v3 = vld [vmem:[%s3687_s7] sm:$0xff] }
0x170d   :  { %3125 = vtanh.f32 %v3038_v8 }
0x1717   :  { %v3126_v19 = vpop.eup %3125 }
0x1718   :  { %v2296_v20 = vmul.f32 %v3126_v19, %v3296_v23  ;;  %v2316_v23 = vld [vmem:[%s3687_s7 + $0x8] sm:$0xff] }
0x1719   :  { %v3026_v22 = vpack.c.bf16 %v2316_v23, %v2315_v3 }
0x171a   :  { %v2297_v56 = vadd.f32 %v2296_v20, %v3298_v25  ;;  %v2317_v25 = vld [vmem:[%s3687_s7 + $0x10] sm:$0xff]  ;;  %s3186_s7 = smov [#allocation5]  }
0x171b   :  { %3027 = vmatpush3.bf16.msra.mxu1 %v3026_v22  ;;  %v3029_v26 = vpack.c.bf16 %v2318_v24, %v2317_v25  ;;  %s2408_s28 = sshll.u32 %s3186_s7, 4  ;;  %s2409_s28 = int_to_ptr.vmem [resolvable:$true] %s2408_s28 }
0x171c   :  { %2300 = vrot.lane.b32.xlu0 %v2297_v56, %s3184_s3  ;;  %v2298_v60 = vmul.f32 %v2297_v56, %v2046_v6  ;;  %3028 = vmatprep.subr.bf16.mxu1 %v3180_v0  ;;  %s3151_s29 = scalar_lea.vmem %s2409_s28, 128  ;;  %p3156_p9 = scmp.lt.s32.totalorder %s2409_s28, %s2409_s28 }
0x171d   :  { %p3152_p8 = scmp.ne.s32.totalorder %s2409_s28, %s3151_s29  ;;  %p3157_p10 = scmp.lt.s32.totalorder %s3151_s29, %s3151_s29 }
0x171f   :  { %3030 = vmatpush3.bf16.msra.mxu1 %v3029_v26  ;;  %p3158_p11 = por %p3157_p10, %p3156_p9 }
0x1721   :  { %p3159_p12 = pnand %p3158_p11, %p3152_p8 }
0x178e   :  { %v2301_v1 = vpop.permute.xlu0 %2300 }
0x178f   :  { %v2303_v12 = vmul.f32 %v2301_v1, %v2297_v56 }
0x1791   :  { %2305 = vrot.lane.b32.xlu1 %v2303_v12, %s3185_s14 }
0x1803   :  { %v2306_v21 = vpop.permute.xlu1 %2305 }
0x1804   :  { %v2308_v53 = vadd.f32 %v2306_v21, %v2298_v60 }
0x1806   :  { %3127 = vtanh.f32 %v2308_v53 }
0x1810   :  { %v3128_v27 = vpop.eup %3127 }
0x1811   :  { %2311 = vrot.lane.b32.xlu0 %v3128_v27, %s3184_s3 }
0x1883   :  { %v2312_v28 = vpop.permute.xlu0 %2311 }
0x1884   :  { %v2314_v29 = vmul.f32 %v2312_v28, %v2297_v56 }
0x1886   :  { %2327 = vrot.lane.b32.xlu1 %v2314_v29, %s3185_s14 }
0x18f8   :  { %v2328_v30 = vpop.permute.xlu1 %2327 }
0x18f9   :  { %2875 = vmatmul.mubr.msk.f32.vlgmr.msra.gmra.mrb[16].mxu1 %vm214_vm5, %v2328_v30 }
0x19cc   :  { %v2397_v48 = vpop.f32.mrb[16].mxu1 }
0x19cd   :  { %v2398_v33 = vadd.f32 %v2449_v31, %v2397_v48  ;;  %v2876_v0 = vpop.f32.mrb[17].mxu1 }
0x19cf   :  { %2401 = vst [vmem:[#allocation5] sm:$0xff] %v2398_v33 }
0x19d0   :  { %3162 = shalt.err (!%p3159_p12)
}
0x19d1   :  { %s3163_s30 = scalar_lea.hbm %s3689_s9, 128 }
0x19d2   :  { %p3164_p13 = scmp.ne.s32.totalorder %s3689_s9, %s3163_s30  ;;  %p3167_p0 = scmp.lt.u32.totalorder %s3163_s30, %s3689_s9 }
0x19d4   :  { %p3169_p1 = pnand %p3167_p0, %p3164_p13 }
0x19d6   :  { %3172 = shalt.err (!%p3169_p1)
}
0x19d7   :  { %2411 = dma.vmem_to_hbm [thread:$0]  %s2409_s28, 128, %s3689_s9, [#allocation4]  }
0x19d8   :  { %3175 = dma.done.wait [#allocation4], 128  }
0x19d9   :  { %3176 = vsyncadd [#allocation4], 4294967168 }
0x19da   :  { %2415 = vsyncpa [#allocation3], 1 }
0x19db   :  { %2416 = vsyncpa [#allocation4], 1 }

</bundles_post_ra>
